<compile_context>
chip_gen: v7x
topology: tpu7x:2x2x1
jax: 0.10.0
libtpu: 0.0.40
codegen_flags: <defaults>
</compile_context>

<pallas_src>
import math
from functools import partial

import jax
import jax.numpy as jnp
from jax import lax
from jax.experimental import pallas as pl
from jax.experimental.pallas import tpu as pltpu

# Tile candidates (largest that evenly divides wins; else full dim fallback).
_LINEAR_MN_TILES = (1024, 512, 256, 128)
_LINEAR_K_TILES = (512, 256, 128)
_ATTN_Q_TILES = (1024, 512, 256, 128)
_ATTN_KV_TILES = (512, 256, 128)


def _vmem_limit_bytes():
    """Generation-aware scoped-VMEM limit.

    v5e/v6e have 128 MiB physical VMEM (scoped default only 16/32 MiB), so an
    explicit ~96 MiB limit unlocks the larger tiles.  v7x has only 64 MiB
    physical, so stay at 48 MiB and leave headroom for Mosaic internal scratch
    (the (tq, tkv) f32 score/probability intermediates).
    """
    try:
        phys = pltpu.get_tpu_info().vmem_capacity_bytes
    except Exception:
        phys = None
    if phys is not None and phys >= 128 * 1024 * 1024:
        return 96 * 1024 * 1024
    return 48 * 1024 * 1024


def _pick_tile(dim, candidates):
    """Largest candidate tile that evenly divides `dim`; else the full dim."""
    for c in candidates:
        if c <= dim and dim % c == 0:
            return c
    return dim


def _pick_head_group(num_heads, head_dim):
    """Smallest head-group size G (divisor of num_heads) with G*head_dim a
    multiple of 128 (lane-dense blocks); falls back to all heads (full E)."""
    for g in range(1, num_heads + 1):
        if num_heads % g == 0 and (g * head_dim) % 128 == 0:
            return g
    return num_heads


# ----------------------------------------------------------------------------
# Tiled linear kernels (f32 accumulator, bias added at finalize)
# ----------------------------------------------------------------------------
def _linear_kernel(x_ref, w_ref, b_ref, o_ref, acc_ref):
    # grid = (M//tm, N//tn, K//tk); K (reduction) is the innermost axis.
    @pl.when(pl.program_id(2) == 0)
    def _init():
        acc_ref[...] = jnp.zeros(acc_ref.shape, jnp.float32)

    acc_ref[...] += jnp.dot(x_ref[...], w_ref[...],
                            preferred_element_type=jnp.float32)

    @pl.when(pl.program_id(2) == pl.num_programs(2) - 1)
    def _finalize():
        o_ref[...] = (acc_ref[...] + b_ref[...]).astype(o_ref.dtype)


def linear(x2d, w, b):
    """x2d: (M, K) @ w: (K, N) + b: (N,) -> (M, N), tiled over (M, N, K)."""
    M, K = x2d.shape
    _, N = w.shape
    tm = _pick_tile(M, _LINEAR_MN_TILES)
    tn = _pick_tile(N, _LINEAR_MN_TILES)
    tk = _pick_tile(K, _LINEAR_K_TILES)
    grid = (M // tm, N // tn, K // tk)
    itemsize = x2d.dtype.itemsize
    return pl.pallas_call(
        _linear_kernel,
        grid=grid,
        in_specs=[
            pl.BlockSpec((tm, tk), lambda i, j, k: (i, k)),
            pl.BlockSpec((tk, tn), lambda i, j, k: (k, j)),
            pl.BlockSpec((1, tn), lambda i, j, k: (0, j)),
        ],
        out_specs=pl.BlockSpec((tm, tn), lambda i, j, k: (i, j)),
        out_shape=jax.ShapeDtypeStruct((M, N), x2d.dtype),
        scratch_shapes=[pltpu.VMEM((tm, tn), jnp.float32)],
        compiler_params=pltpu.CompilerParams(
            dimension_semantics=("parallel", "parallel", "arbitrary"),
            vmem_limit_bytes=_vmem_limit_bytes()),
        cost_estimate=pl.CostEstimate(
            flops=2 * M * N * K, transcendentals=0,
            bytes_accessed=(M * K + K * N + M * N) * itemsize),
    )(x2d, w, b.reshape(1, N))


def _qkv_proj_kernel(x_ref, w_ref, b_ref, o_ref, acc_ref):
    # grid = (3, M//tm, N//tn, K//tk); axis 0 selects q/k/v, K is innermost.
    @pl.when(pl.program_id(3) == 0)
    def _init():
        acc_ref[...] = jnp.zeros(acc_ref.shape, jnp.float32)

    acc_ref[...] += jnp.dot(x_ref[...], w_ref[...],
                            preferred_element_type=jnp.float32)

    @pl.when(pl.program_id(3) == pl.num_programs(3) - 1)
    def _finalize():
        o_ref[...] = (acc_ref[...] + b_ref[...]).astype(o_ref.dtype)


def qkv_projection(x2d, w3, b3):
    """x2d: (M, E); w3: (3, E, E) [q|k|v]; b3: (3, E) -> (3, M, E)."""
    M, K = x2d.shape
    _, _, N = w3.shape
    tm = _pick_tile(M, _LINEAR_MN_TILES)
    tn = _pick_tile(N, _LINEAR_MN_TILES)
    tk = _pick_tile(K, _LINEAR_K_TILES)
    grid = (3, M // tm, N // tn, K // tk)
    itemsize = x2d.dtype.itemsize
    return pl.pallas_call(
        _qkv_proj_kernel,
        grid=grid,
        in_specs=[
            pl.BlockSpec((tm, tk), lambda c, i, j, k: (i, k)),
            pl.BlockSpec((None, tk, tn), lambda c, i, j, k: (c, k, j)),
            pl.BlockSpec((None, 1, tn), lambda c, i, j, k: (c, 0, j)),
        ],
        out_specs=pl.BlockSpec((None, tm, tn), lambda c, i, j, k: (c, i, j)),
        out_shape=jax.ShapeDtypeStruct((3, M, N), x2d.dtype),
        scratch_shapes=[pltpu.VMEM((tm, tn), jnp.float32)],
        compiler_params=pltpu.CompilerParams(
            dimension_semantics=("parallel", "parallel", "parallel", "arbitrary"),
            vmem_limit_bytes=_vmem_limit_bytes()),
        cost_estimate=pl.CostEstimate(
            flops=2 * 3 * M * N * K, transcendentals=0,
            bytes_accessed=(3 * M * K + 3 * K * N + 3 * M * N) * itemsize),
    )(x2d, w3, b3.reshape(3, 1, N))


# ----------------------------------------------------------------------------
# Flash-style attention: online softmax over KV tiles, head-group grid axis
# ----------------------------------------------------------------------------
def _flash_mha_kernel(q_ref, k_ref, v_ref, o_ref, m_sc, l_sc, acc_sc, *,
                      heads_per_group, head_dim):
    """One (batch, q-tile, head-group) x one kv-tile step.

    q_ref: (tq,  G*D)  lanes [h*D:(h+1)*D] hold head h of this group
    k_ref: (tkv, G*D)
    v_ref: (tkv, G*D)
    o_ref: (tq,  G*D)  lane-dense output slab (written only at last kv step)
    m_sc / l_sc: (G, tq, 1) f32 running max / denom;  acc_sc: (G, tq, D) f32
    The softmax scale is pre-folded into the Q projection weights.
    """
    kv_i = pl.program_id(3)

    @pl.when(kv_i == 0)
    def _init():
        m_sc[...] = jnp.full(m_sc.shape, -jnp.inf, jnp.float32)
        l_sc[...] = jnp.zeros(l_sc.shape, jnp.float32)
        acc_sc[...] = jnp.zeros(acc_sc.shape, jnp.float32)

    # bf16 exp only when the model itself runs bf16 (v6e/v7x EUP relief; p is
    # cast to the model dtype for the PV matmul anyway). f32 models keep full
    # f32 softmax (also the right call on v5e, which has no bf16 EUP path).
    exp_dtype = jnp.bfloat16 if q_ref.dtype == jnp.bfloat16 else jnp.float32

    # Short, bounded unroll over the G heads of this group only.
    for h in range(heads_per_group):
        sl = slice(h * head_dim, (h + 1) * head_dim)
        qh = q_ref[:, sl]
        kh = k_ref[:, sl]
        vh = v_ref[:, sl]

        # Contract on the last dims -> no (tkv, D) XLU transpose materialized.
        s = lax.dot_general(qh, kh, (((1,), (1,)), ((), ())),
                            preferred_element_type=jnp.float32)   # (tq, tkv)

        m_prev = m_sc[h]
        m_new = jnp.maximum(m_prev, jnp.max(s, axis=-1, keepdims=True))
        alpha = jnp.exp(m_prev - m_new)                            # f32 (EUP)
        p = jnp.exp((s - m_new).astype(exp_dtype))

        l_sc[h] = alpha * l_sc[h] + jnp.sum(p.astype(jnp.float32),
                                            axis=-1, keepdims=True)
        acc_sc[h] = alpha * acc_sc[h] + jnp.dot(
            p.astype(vh.dtype), vh, preferred_element_type=jnp.float32)
        m_sc[h] = m_new

    @pl.when(kv_i == pl.num_programs(3) - 1)
    def _finalize():
        for h in range(heads_per_group):
            sl = slice(h * head_dim, (h + 1) * head_dim)
            # exact reciprocal keeps the 1e-4 tolerance; approx=True is an
            # essentially-free EUP alternative when tolerances allow.
            inv_l = pl.reciprocal(l_sc[h], approx=False)
            o_ref[:, sl] = (acc_sc[h] * inv_l).astype(o_ref.dtype)


def flash_attention(qkv3, num_heads):
    """qkv3: (3, B, S, E) with q/k/v stacked on axis 0 -> context (B, S, E)."""
    _, B, S, E = qkv3.shape
    head_dim = E // num_heads
    heads_per_group = _pick_head_group(num_heads, head_dim)
    n_groups = num_heads // heads_per_group
    gd = heads_per_group * head_dim                 # lane width of each block

    tq = _pick_tile(S, _ATTN_Q_TILES)
    tkv = _pick_tile(S, _ATTN_KV_TILES)
    # kv (reduction) axis innermost; B / q-tiles / head-groups are parallel.
    grid = (B, S // tq, n_groups, S // tkv)

    q_spec = pl.BlockSpec((None, None, tq, gd), lambda b, qi, g, ki: (0, b, qi, g))
    k_spec = pl.BlockSpec((None, None, tkv, gd), lambda b, qi, g, ki: (1, b, ki, g))
    v_spec = pl.BlockSpec((None, None, tkv, gd), lambda b, qi, g, ki: (2, b, ki, g))
    o_spec = pl.BlockSpec((None, tq, gd), lambda b, qi, g, ki: (b, qi, g))

    itemsize = qkv3.dtype.itemsize
    return pl.pallas_call(
        partial(_flash_mha_kernel,
                heads_per_group=heads_per_group, head_dim=head_dim),
        grid=grid,
        in_specs=[q_spec, k_spec, v_spec],
        out_specs=o_spec,
        out_shape=jax.ShapeDtypeStruct((B, S, E), qkv3.dtype),
        scratch_shapes=[
            pltpu.VMEM((heads_per_group, tq, 1), jnp.float32),        # run. max
            pltpu.VMEM((heads_per_group, tq, 1), jnp.float32),        # run. denom
            pltpu.VMEM((heads_per_group, tq, head_dim), jnp.float32), # run. numer
        ],
        compiler_params=pltpu.CompilerParams(
            dimension_semantics=("parallel", "parallel", "parallel", "arbitrary"),
            vmem_limit_bytes=_vmem_limit_bytes()),
        cost_estimate=pl.CostEstimate(
            flops=4 * B * S * S * E,
            transcendentals=B * num_heads * S * S,
            bytes_accessed=4 * B * S * E * itemsize),
    )(qkv3, qkv3, qkv3)


# ----------------------------------------------------------------------------
# ParallelMHA forward (world_size = 1)
# ----------------------------------------------------------------------------
def repack_params(wqkv, bqkv, wout, bout, embed_dim, num_heads,
                  softmax_scale=None):
    """One-time repack of the fused Wqkv (columns ordered three-major q|k|v)
    into (3, E, E)/(3, E) blocks, with the softmax scale folded into the Q
    projection (removes the per-kv-step Q rescale inside the kernel)."""
    head_dim = embed_dim // num_heads
    scale = softmax_scale if softmax_scale is not None else 1.0 / math.sqrt(head_dim)
    wqkv3 = wqkv.reshape(embed_dim, 3, embed_dim).transpose(1, 0, 2)
    bqkv3 = bqkv.reshape(3, embed_dim)
    wqkv3 = wqkv3.at[0].multiply(scale)
    bqkv3 = bqkv3.at[0].multiply(scale)
    return {"wqkv3": wqkv3, "bqkv3": bqkv3, "wout": wout, "bout": bout}


def parallel_mha_forward(x, params, num_heads):
    B, S, E = x.shape

    # Wqkv (ColumnParallelLinear, world_size=1): tiled matmul emitting a
    # (3, B*S, E) slab -> attention indexes q/k/v via BlockSpecs, no XLA-side
    # transposes or qkv splits between the kernels.
    qkv3 = qkv_projection(x.reshape(B * S, E), params["wqkv3"], params["bqkv3"])
    qkv3 = qkv3.reshape(3, B, S, E)                        # contiguous reshape

    # SelfAttention (non-causal, dropout=0): flash online softmax over KV tiles.
    ctx = flash_attention(qkv3, num_heads)                 # (B, S, E) lane-dense

    # out_proj (RowParallelLinear, world_size=1): tiled matmul.
    out = linear(ctx.reshape(B * S, E), params["wout"], params["bout"])
    return out.reshape(B, S, E)
    # TODO(synk): rotary embeddings and the inference_params KV-cache paths are
    # not exercised by the default forward (rotary_emb_dim=0, inference_params=None).


# ----------------------------------------------------------------------------
# Pure-JAX reference (fused Wqkv, matches PyTorch SelfAttention + Linear)
# ----------------------------------------------------------------------------
def ref_forward(x, params, num_heads):
    B, S, E = x.shape
    D = E // num_heads
    qkv = x @ params["wqkv"] + params["bqkv"]
    qkv = qkv.reshape(B, S, 3, num_heads, D)
    q, k, v = qkv[:, :, 0], qkv[:, :, 1], qkv[:, :, 2]
    scale = 1.0 / math.sqrt(D)
    s = jnp.einsum("bshd,bthd->bhst", q, k) * scale
    p = jax.nn.softmax(s, axis=-1)
    ctx = jnp.einsum("bhst,bthd->bshd", p, v).reshape(B, S, E)
    return ctx @ params["wout"] + params["bout"]


# ----------------------------------------------------------------------------
if __name__ == "__main__":
    # Module config (small): embed_dim=32, num_heads=4, head_dim=8
    batch, seqlen, embed_dim, num_heads = 2, 8, 32, 4
    head_dim = embed_dim // num_heads
    qkv_dim = head_dim * (num_heads + 2 * num_heads)   # num_heads_kv == num_heads

    key = jax.random.PRNGKey(0)
    kx, kw1, kb1, kw2, kb2 = jax.random.split(key, 5)

    x = jax.random.normal(kx, (batch, seqlen, embed_dim), dtype=jnp.float32)

    # Fused parameters, stored already transposed: (in, out), columns q|k|v.
    wqkv = jax.random.normal(kw1, (embed_dim, qkv_dim), dtype=jnp.float32) * 0.05
    bqkv = jax.random.normal(kb1, (qkv_dim,), dtype=jnp.float32) * 0.05
    wout = jax.random.normal(kw2, (embed_dim, embed_dim), dtype=jnp.float32) * 0.05
    bout = jax.random.normal(kb2, (embed_dim,), dtype=jnp.float32) * 0.05

    params = repack_params(wqkv, bqkv, wout, bout, embed_dim, num_heads)
    ref_params = {"wqkv": wqkv, "bqkv": bqkv, "wout": wout, "bout": bout}

    fwd = jax.jit(partial(parallel_mha_forward, num_heads=num_heads))
    out = jax.block_until_ready(fwd(x, params))

    ref = ref_forward(x, ref_params, num_heads)
    assert out.shape == (batch, seqlen, embed_dim)
    assert jnp.allclose(out, ref, rtol=1e-4, atol=1e-4), "mismatch vs reference"

    print("KERNEL_OK")
</pallas_src>

<mosaic_0001>
module attributes {stable_mosaic.version = 11 : i64} {
  func.func @_linear_kernel(%arg0: i32, %arg1: i32, %arg2: i32, %arg3: memref<16x32xf32, #tpu.memory_space<vmem>>, %arg4: memref<32x32xf32, #tpu.memory_space<vmem>>, %arg5: memref<1x32xf32, #tpu.memory_space<vmem>>, %arg6: memref<16x32xf32, #tpu.memory_space<vmem>>, %arg7: memref<16x32xf32, #tpu.memory_space<vmem>>) attributes {dimension_semantics = [#tpu.dimension_semantics<parallel>, #tpu.dimension_semantics<parallel>, #tpu.dimension_semantics<arbitrary>], iteration_bounds = array<i64: 1, 1, 1>, scalar_prefetch = 0 : i64, scratch_operands = 1 : i64, tpu.core_type = #tpu.core_type<tc>, window_params = [{transform_indices = @transform_0, window_bounds = array<i64: 16, 32>}, {transform_indices = @transform_1, window_bounds = array<i64: 32, 32>}, {transform_indices = @transform_2, window_bounds = array<i64: 1, 32>}, {transform_indices = @transform_3, window_bounds = array<i64: 16, 32>}]} {
    %c0_i32 = arith.constant 0 : i32
    %0 = arith.cmpi eq, %arg2, %c0_i32 : i32
    %1 = arith.extui %0 : i1 to i32
    %c0_i32_0 = arith.constant 0 : i32
    %2 = arith.cmpi ne, %1, %c0_i32_0 : i32
    scf.if %2 {
      %cst_10 = arith.constant 0.000000e+00 : f32
      %12 = vector.broadcast %cst_10 : f32 to vector<16x32xf32>
      %c0_11 = arith.constant 0 : index
      %c0_12 = arith.constant 0 : index
      %13 = vector.load %arg7[%c0_11, %c0_12] : memref<16x32xf32, #tpu.memory_space<vmem>>, vector<16x32xf32>
      tpu.vector_store %arg7[%c0_11, %c0_12], %12 {strides = array<i32>} : memref<16x32xf32, #tpu.memory_space<vmem>>, vector<16x32xf32>,
    } else {
    }
    %c0 = arith.constant 0 : index
    %c0_1 = arith.constant 0 : index
    %3 = vector.load %arg7[%c0, %c0_1] : memref<16x32xf32, #tpu.memory_space<vmem>>, vector<16x32xf32>
    %c0_2 = arith.constant 0 : index
    %c0_3 = arith.constant 0 : index
    %4 = vector.load %arg3[%c0_2, %c0_3] : memref<16x32xf32, #tpu.memory_space<vmem>>, vector<16x32xf32>
    %c0_4 = arith.constant 0 : index
    %c0_5 = arith.constant 0 : index
    %5 = vector.load %arg4[%c0_4, %c0_5] : memref<32x32xf32, #tpu.memory_space<vmem>>, vector<32x32xf32>
    %cst = arith.constant dense<0.000000e+00> : vector<16x32xf32>
    %6 = tpu.matmul %4, %5, %cst {dimension_numbers = #tpu.dot_dimension_numbers<[1], [0], [0], [1], [0, 0, 1, 1], [], []>} : vector<16x32xf32>, vector<32x32xf32>, vector<16x32xf32> -> vector<16x32xf32>
    %7 = arith.addf %3, %6 : vector<16x32xf32>
    %c0_6 = arith.constant 0 : index
    %c0_7 = arith.constant 0 : index
    %8 = vector.load %arg7[%c0_6, %c0_7] : memref<16x32xf32, #tpu.memory_space<vmem>>, vector<16x32xf32>
    tpu.vector_store %arg7[%c0_6, %c0_7], %7 {strides = array<i32>} : memref<16x32xf32, #tpu.memory_space<vmem>>, vector<16x32xf32>,
    %c0_i32_8 = arith.constant 0 : i32
    %9 = arith.cmpi eq, %arg2, %c0_i32_8 : i32
    %10 = arith.extui %9 : i1 to i32
    %c0_i32_9 = arith.constant 0 : i32
    %11 = arith.cmpi ne, %10, %c0_i32_9 : i32
    scf.if %11 {
      %c0_10 = arith.constant 0 : index
      %c0_11 = arith.constant 0 : index
      %12 = vector.load %arg7[%c0_10, %c0_11] : memref<16x32xf32, #tpu.memory_space<vmem>>, vector<16x32xf32>
      %c0_12 = arith.constant 0 : index
      %c0_13 = arith.constant 0 : index
      %13 = vector.load %arg5[%c0_12, %c0_13] : memref<1x32xf32, #tpu.memory_space<vmem>>, vector<1x32xf32>
      %14 = vector.broadcast %13 : vector<1x32xf32> to vector<16x32xf32>
      %15 = arith.addf %12, %14 : vector<16x32xf32>
      %c0_14 = arith.constant 0 : index
      %c0_15 = arith.constant 0 : index
      %16 = vector.load %arg6[%c0_14, %c0_15] : memref<16x32xf32, #tpu.memory_space<vmem>>, vector<16x32xf32>
      tpu.vector_store %arg6[%c0_14, %c0_15], %15 {strides = array<i32>} : memref<16x32xf32, #tpu.memory_space<vmem>>, vector<16x32xf32>,
    } else {
    }
    return
  }
  func.func @transform_0(%arg0: i32, %arg1: i32, %arg2: i32) -> (i32, i32) {
    %c0_i32 = arith.constant 0 : i32
    return %arg0, %arg2 : i32, i32
  }
  func.func @transform_1(%arg0: i32, %arg1: i32, %arg2: i32) -> (i32, i32) {
    %c0_i32 = arith.constant 0 : i32
    return %arg2, %arg1 : i32, i32
  }
  func.func @transform_2(%arg0: i32, %arg1: i32, %arg2: i32) -> (i32, i32) {
    %c0_i32 = arith.constant 0 : i32
    %c0_i32_0 = arith.constant 0 : i32
    return %c0_i32, %arg1 : i32, i32
  }
  func.func @transform_3(%arg0: i32, %arg1: i32, %arg2: i32) -> (i32, i32) {
    %c0_i32 = arith.constant 0 : i32
    return %arg0, %arg1 : i32, i32
  }
}

module attributes {stable_mosaic.version = 11 : i64} {
  func.func @_qkv_proj_kernel(%arg0: i32, %arg1: i32, %arg2: i32, %arg3: i32, %arg4: memref<16x32xf32, #tpu.memory_space<vmem>>, %arg5: memref<1x32x32xf32, #tpu.memory_space<vmem>>, %arg6: memref<1x1x32xf32, #tpu.memory_space<vmem>>, %arg7: memref<1x16x32xf32, #tpu.memory_space<vmem>>, %arg8: memref<16x32xf32, #tpu.memory_space<vmem>>) attributes {dimension_semantics = [#tpu.dimension_semantics<parallel>, #tpu.dimension_semantics<parallel>, #tpu.dimension_semantics<parallel>, #tpu.dimension_semantics<arbitrary>], iteration_bounds = array<i64: 3, 1, 1, 1>, scalar_prefetch = 0 : i64, scratch_operands = 1 : i64, tpu.core_type = #tpu.core_type<tc>, window_params = [{transform_indices = @transform_0, window_bounds = array<i64: 16, 32>}, {transform_indices = @transform_1, window_bounds = array<i64: 1, 32, 32>}, {transform_indices = @transform_2, window_bounds = array<i64: 1, 1, 32>}, {transform_indices = @transform_3, window_bounds = array<i64: 1, 16, 32>}]} {
    %c0_i32 = arith.constant 0 : i32
    %0 = arith.cmpi eq, %arg3, %c0_i32 : i32
    %1 = arith.extui %0 : i1 to i32
    %c0_i32_0 = arith.constant 0 : i32
    %2 = arith.cmpi ne, %1, %c0_i32_0 : i32
    scf.if %2 {
      %cst_11 = arith.constant 0.000000e+00 : f32
      %13 = vector.broadcast %cst_11 : f32 to vector<16x32xf32>
      %c0_12 = arith.constant 0 : index
      %c0_13 = arith.constant 0 : index
      %14 = vector.load %arg8[%c0_12, %c0_13] : memref<16x32xf32, #tpu.memory_space<vmem>>, vector<16x32xf32>
      tpu.vector_store %arg8[%c0_12, %c0_13], %13 {strides = array<i32>} : memref<16x32xf32, #tpu.memory_space<vmem>>, vector<16x32xf32>,
    } else {
    }
    %c0 = arith.constant 0 : index
    %c0_1 = arith.constant 0 : index
    %3 = vector.load %arg8[%c0, %c0_1] : memref<16x32xf32, #tpu.memory_space<vmem>>, vector<16x32xf32>
    %c0_2 = arith.constant 0 : index
    %c0_3 = arith.constant 0 : index
    %4 = vector.load %arg4[%c0_2, %c0_3] : memref<16x32xf32, #tpu.memory_space<vmem>>, vector<16x32xf32>
    %c0_4 = arith.constant 0 : index
    %c0_5 = arith.constant 0 : index
    %c0_6 = arith.constant 0 : index
    %5 = vector.load %arg5[%c0_4, %c0_5, %c0_6] : memref<1x32x32xf32, #tpu.memory_space<vmem>>, vector<1x32x32xf32>
    %6 = vector.shape_cast %5 : vector<1x32x32xf32> to vector<32x32xf32>
    %cst = arith.constant dense<0.000000e+00> : vector<16x32xf32>
    %7 = tpu.matmul %4, %6, %cst {dimension_numbers = #tpu.dot_dimension_numbers<[1], [0], [0], [1], [0, 0, 1, 1], [], []>} : vector<16x32xf32>, vector<32x32xf32>, vector<16x32xf32> -> vector<16x32xf32>
    %8 = arith.addf %3, %7 : vector<16x32xf32>
    %c0_7 = arith.constant 0 : index
    %c0_8 = arith.constant 0 : index
    %9 = vector.load %arg8[%c0_7, %c0_8] : memref<16x32xf32, #tpu.memory_space<vmem>>, vector<16x32xf32>
    tpu.vector_store %arg8[%c0_7, %c0_8], %8 {strides = array<i32>} : memref<16x32xf32, #tpu.memory_space<vmem>>, vector<16x32xf32>,
    %c0_i32_9 = arith.constant 0 : i32
    %10 = arith.cmpi eq, %arg3, %c0_i32_9 : i32
    %11 = arith.extui %10 : i1 to i32
    %c0_i32_10 = arith.constant 0 : i32
    %12 = arith.cmpi ne, %11, %c0_i32_10 : i32
    scf.if %12 {
      %c0_11 = arith.constant 0 : index
      %c0_12 = arith.constant 0 : index
      %13 = vector.load %arg8[%c0_11, %c0_12] : memref<16x32xf32, #tpu.memory_space<vmem>>, vector<16x32xf32>
      %c0_13 = arith.constant 0 : index
      %c0_14 = arith.constant 0 : index
      %c0_15 = arith.constant 0 : index
      %14 = vector.load %arg6[%c0_13, %c0_14, %c0_15] : memref<1x1x32xf32, #tpu.memory_space<vmem>>, vector<1x1x32xf32>
      %15 = vector.shape_cast %14 : vector<1x1x32xf32> to vector<1x32xf32>
      %16 = vector.broadcast %15 : vector<1x32xf32> to vector<16x32xf32>
      %17 = arith.addf %13, %16 : vector<16x32xf32>
      %c0_16 = arith.constant 0 : index
      %c0_17 = arith.constant 0 : index
      %c0_18 = arith.constant 0 : index
      %18 = vector.load %arg7[%c0_16, %c0_17, %c0_18] : memref<1x16x32xf32, #tpu.memory_space<vmem>>, vector<1x16x32xf32>
      %19 = vector.shape_cast %18 : vector<1x16x32xf32> to vector<16x32xf32>
      %20 = vector.shape_cast %17 : vector<16x32xf32> to vector<1x16x32xf32>
      tpu.vector_store %arg7[%c0_16, %c0_17, %c0_18], %20 {strides = array<i32>} : memref<1x16x32xf32, #tpu.memory_space<vmem>>, vector<1x16x32xf32>,
    } else {
    }
    return
  }
  func.func @transform_0(%arg0: i32, %arg1: i32, %arg2: i32, %arg3: i32) -> (i32, i32) {
    %c0_i32 = arith.constant 0 : i32
    return %arg1, %arg3 : i32, i32
  }
  func.func @transform_1(%arg0: i32, %arg1: i32, %arg2: i32, %arg3: i32) -> (i32, i32, i32) {
    %c0_i32 = arith.constant 0 : i32
    return %arg0, %arg3, %arg2 : i32, i32, i32
  }
  func.func @transform_2(%arg0: i32, %arg1: i32, %arg2: i32, %arg3: i32) -> (i32, i32, i32) {
    %c0_i32 = arith.constant 0 : i32
    %c0_i32_0 = arith.constant 0 : i32
    return %arg0, %c0_i32, %arg2 : i32, i32, i32
  }
  func.func @transform_3(%arg0: i32, %arg1: i32, %arg2: i32, %arg3: i32) -> (i32, i32, i32) {
    %c0_i32 = arith.constant 0 : i32
    return %arg0, %arg1, %arg2 : i32, i32, i32
  }
}

module attributes {stable_mosaic.version = 11 : i64} {
  func.func @_flash_mha_kernel(%arg0: i32, %arg1: i32, %arg2: i32, %arg3: i32, %arg4: memref<1x1x8x32xf32, #tpu.memory_space<vmem>>, %arg5: memref<1x1x8x32xf32, #tpu.memory_space<vmem>>, %arg6: memref<1x1x8x32xf32, #tpu.memory_space<vmem>>, %arg7: memref<1x8x32xf32, #tpu.memory_space<vmem>>, %arg8: memref<4x8x1xf32, #tpu.memory_space<vmem>>, %arg9: memref<4x8x1xf32, #tpu.memory_space<vmem>>, %arg10: memref<4x8x8xf32, #tpu.memory_space<vmem>>) attributes {dimension_semantics = [#tpu.dimension_semantics<parallel>, #tpu.dimension_semantics<parallel>, #tpu.dimension_semantics<parallel>, #tpu.dimension_semantics<arbitrary>], iteration_bounds = array<i64: 2, 1, 1, 1>, scalar_prefetch = 0 : i64, scratch_operands = 3 : i64, tpu.core_type = #tpu.core_type<tc>, window_params = [{transform_indices = @transform_0, window_bounds = array<i64: 1, 1, 8, 32>}, {transform_indices = @transform_1, window_bounds = array<i64: 1, 1, 8, 32>}, {transform_indices = @transform_2, window_bounds = array<i64: 1, 1, 8, 32>}, {transform_indices = @transform_3, window_bounds = array<i64: 1, 8, 32>}]} {
    %c0_i32 = arith.constant 0 : i32
    %0 = arith.cmpi eq, %arg3, %c0_i32 : i32
    %1 = arith.extui %0 : i1 to i32
    %c0_i32_0 = arith.constant 0 : i32
    %2 = arith.cmpi ne, %1, %c0_i32_0 : i32
    scf.if %2 {
      %cst_131 = arith.constant 0xFF800000 : f32
      %158 = vector.broadcast %cst_131 : f32 to vector<4x8x1xf32>
      %c0_132 = arith.constant 0 : index
      %c0_133 = arith.constant 0 : index
      %c0_134 = arith.constant 0 : index
      %159 = vector.load %arg8[%c0_132, %c0_133, %c0_134] : memref<4x8x1xf32, #tpu.memory_space<vmem>>, vector<4x8x1xf32>
      tpu.vector_store %arg8[%c0_132, %c0_133, %c0_134], %158 {strides = array<i32>} : memref<4x8x1xf32, #tpu.memory_space<vmem>>, vector<4x8x1xf32>,
      %cst_135 = arith.constant 0.000000e+00 : f32
      %160 = vector.broadcast %cst_135 : f32 to vector<4x8x1xf32>
      %c0_136 = arith.constant 0 : index
      %c0_137 = arith.constant 0 : index
      %c0_138 = arith.constant 0 : index
      %161 = vector.load %arg9[%c0_136, %c0_137, %c0_138] : memref<4x8x1xf32, #tpu.memory_space<vmem>>, vector<4x8x1xf32>
      tpu.vector_store %arg9[%c0_136, %c0_137, %c0_138], %160 {strides = array<i32>} : memref<4x8x1xf32, #tpu.memory_space<vmem>>, vector<4x8x1xf32>,
      %cst_139 = arith.constant 0.000000e+00 : f32
      %162 = vector.broadcast %cst_139 : f32 to vector<4x8x8xf32>
      %c0_140 = arith.constant 0 : index
      %c0_141 = arith.constant 0 : index
      %c0_142 = arith.constant 0 : index
      %163 = vector.load %arg10[%c0_140, %c0_141, %c0_142] : memref<4x8x8xf32, #tpu.memory_space<vmem>>, vector<4x8x8xf32>
      tpu.vector_store %arg10[%c0_140, %c0_141, %c0_142], %162 {strides = array<i32>} : memref<4x8x8xf32, #tpu.memory_space<vmem>>, vector<4x8x8xf32>,
    } else {
    }
    %c0 = arith.constant 0 : index
    %c0_1 = arith.constant 0 : index
    %c0_2 = arith.constant 0 : index
    %c0_3 = arith.constant 0 : index
    %3 = vector.load %arg4[%c0, %c0_1, %c0_2, %c0_3] : memref<1x1x8x32xf32, #tpu.memory_space<vmem>>, vector<1x1x8x8xf32>
    %4 = vector.shape_cast %3 : vector<1x1x8x8xf32> to vector<8x8xf32>
    %c0_4 = arith.constant 0 : index
    %c0_5 = arith.constant 0 : index
    %c0_6 = arith.constant 0 : index
    %c0_7 = arith.constant 0 : index
    %5 = vector.load %arg5[%c0_4, %c0_5, %c0_6, %c0_7] : memref<1x1x8x32xf32, #tpu.memory_space<vmem>>, vector<1x1x8x8xf32>
    %6 = vector.shape_cast %5 : vector<1x1x8x8xf32> to vector<8x8xf32>
    %c0_8 = arith.constant 0 : index
    %c0_9 = arith.constant 0 : index
    %c0_10 = arith.constant 0 : index
    %c0_11 = arith.constant 0 : index
    %7 = vector.load %arg6[%c0_8, %c0_9, %c0_10, %c0_11] : memref<1x1x8x32xf32, #tpu.memory_space<vmem>>, vector<1x1x8x8xf32>
    %8 = vector.shape_cast %7 : vector<1x1x8x8xf32> to vector<8x8xf32>
    %cst = arith.constant dense<0.000000e+00> : vector<8x8xf32>
    %9 = tpu.matmul %4, %6, %cst {dimension_numbers = #tpu.dot_dimension_numbers<[1], [1], [0], [0], [0, 0, 1, 0], [], []>} : vector<8x8xf32>, vector<8x8xf32>, vector<8x8xf32> -> vector<8x8xf32>
    %c0_12 = arith.constant 0 : index
    %c0_13 = arith.constant 0 : index
    %c0_14 = arith.constant 0 : index
    %10 = vector.load %arg8[%c0_12, %c0_13, %c0_14] : memref<4x8x1xf32, #tpu.memory_space<vmem>>, vector<1x8x1xf32>
    %11 = vector.shape_cast %10 : vector<1x8x1xf32> to vector<8x1xf32>
    %cst_15 = arith.constant dense<0xFF800000> : vector<8xf32>
    %12 = vector.multi_reduction <maximumf>, %9, %cst_15 [1] : vector<8x8xf32> to vector<8xf32>
    %13 = vector.shape_cast %12 : vector<8xf32> to vector<8x1xf32>
    %14 = arith.maximumf %11, %13 : vector<8x1xf32>
    %15 = arith.subf %11, %14 : vector<8x1xf32>
    %16 = math.exp %15 : vector<8x1xf32>
    %17 = vector.broadcast %14 : vector<8x1xf32> to vector<8x8xf32>
    %18 = arith.subf %9, %17 : vector<8x8xf32>
    %19 = math.exp %18 : vector<8x8xf32>
    %c0_16 = arith.constant 0 : index
    %c0_17 = arith.constant 0 : index
    %c0_18 = arith.constant 0 : index
    %20 = vector.load %arg9[%c0_16, %c0_17, %c0_18] : memref<4x8x1xf32, #tpu.memory_space<vmem>>, vector<1x8x1xf32>
    %21 = vector.shape_cast %20 : vector<1x8x1xf32> to vector<8x1xf32>
    %22 = arith.mulf %16, %21 : vector<8x1xf32>
    %cst_19 = arith.constant dense<0.000000e+00> : vector<8xf32>
    %23 = vector.multi_reduction <add>, %19, %cst_19 [1] : vector<8x8xf32> to vector<8xf32>
    %24 = vector.shape_cast %23 : vector<8xf32> to vector<8x1xf32>
    %25 = arith.addf %22, %24 : vector<8x1xf32>
    %c0_20 = arith.constant 0 : index
    %c0_21 = arith.constant 0 : index
    %c0_22 = arith.constant 0 : index
    %26 = vector.load %arg9[%c0_20, %c0_21, %c0_22] : memref<4x8x1xf32, #tpu.memory_space<vmem>>, vector<1x8x1xf32>
    %27 = vector.shape_cast %26 : vector<1x8x1xf32> to vector<8x1xf32>
    %28 = vector.shape_cast %25 : vector<8x1xf32> to vector<1x8x1xf32>
    tpu.vector_store %arg9[%c0_20, %c0_21, %c0_22], %28 {strides = array<i32>} : memref<4x8x1xf32, #tpu.memory_space<vmem>>, vector<1x8x1xf32>,
    %c0_23 = arith.constant 0 : index
    %c0_24 = arith.constant 0 : index
    %c0_25 = arith.constant 0 : index
    %29 = vector.load %arg10[%c0_23, %c0_24, %c0_25] : memref<4x8x8xf32, #tpu.memory_space<vmem>>, vector<1x8x8xf32>
    %30 = vector.shape_cast %29 : vector<1x8x8xf32> to vector<8x8xf32>
    %31 = vector.broadcast %16 : vector<8x1xf32> to vector<8x8xf32>
    %32 = arith.mulf %31, %30 : vector<8x8xf32>
    %cst_26 = arith.constant dense<0.000000e+00> : vector<8x8xf32>
    %33 = tpu.matmul %19, %8, %cst_26 {dimension_numbers = #tpu.dot_dimension_numbers<[1], [0], [0], [1], [0, 0, 1, 1], [], []>} : vector<8x8xf32>, vector<8x8xf32>, vector<8x8xf32> -> vector<8x8xf32>
    %34 = arith.addf %32, %33 : vector<8x8xf32>
    %c0_27 = arith.constant 0 : index
    %c0_28 = arith.constant 0 : index
    %c0_29 = arith.constant 0 : index
    %35 = vector.load %arg10[%c0_27, %c0_28, %c0_29] : memref<4x8x8xf32, #tpu.memory_space<vmem>>, vector<1x8x8xf32>
    %36 = vector.shape_cast %35 : vector<1x8x8xf32> to vector<8x8xf32>
    %37 = vector.shape_cast %34 : vector<8x8xf32> to vector<1x8x8xf32>
    tpu.vector_store %arg10[%c0_27, %c0_28, %c0_29], %37 {strides = array<i32>} : memref<4x8x8xf32, #tpu.memory_space<vmem>>, vector<1x8x8xf32>,
    %c0_30 = arith.constant 0 : index
    %c0_31 = arith.constant 0 : index
    %c0_32 = arith.constant 0 : index
    %38 = vector.load %arg8[%c0_30, %c0_31, %c0_32] : memref<4x8x1xf32, #tpu.memory_space<vmem>>, vector<1x8x1xf32>
    %39 = vector.shape_cast %38 : vector<1x8x1xf32> to vector<8x1xf32>
    %40 = vector.shape_cast %14 : vector<8x1xf32> to vector<1x8x1xf32>
    tpu.vector_store %arg8[%c0_30, %c0_31, %c0_32], %40 {strides = array<i32>} : memref<4x8x1xf32, #tpu.memory_space<vmem>>, vector<1x8x1xf32>,
    %c0_33 = arith.constant 0 : index
    %c0_34 = arith.constant 0 : index
    %c0_35 = arith.constant 0 : index
    %c8 = arith.constant 8 : index
    %41 = vector.load %arg4[%c0_33, %c0_34, %c0_35, %c8] : memref<1x1x8x32xf32, #tpu.memory_space<vmem>>, vector<1x1x8x8xf32>
    %42 = vector.shape_cast %41 : vector<1x1x8x8xf32> to vector<8x8xf32>
    %c0_36 = arith.constant 0 : index
    %c0_37 = arith.constant 0 : index
    %c0_38 = arith.constant 0 : index
    %c8_39 = arith.constant 8 : index
    %43 = vector.load %arg5[%c0_36, %c0_37, %c0_38, %c8_39] : memref<1x1x8x32xf32, #tpu.memory_space<vmem>>, vector<1x1x8x8xf32>
    %44 = vector.shape_cast %43 : vector<1x1x8x8xf32> to vector<8x8xf32>
    %c0_40 = arith.constant 0 : index
    %c0_41 = arith.constant 0 : index
    %c0_42 = arith.constant 0 : index
    %c8_43 = arith.constant 8 : index
    %45 = vector.load %arg6[%c0_40, %c0_41, %c0_42, %c8_43] : memref<1x1x8x32xf32, #tpu.memory_space<vmem>>, vector<1x1x8x8xf32>
    %46 = vector.shape_cast %45 : vector<1x1x8x8xf32> to vector<8x8xf32>
    %cst_44 = arith.constant dense<0.000000e+00> : vector<8x8xf32>
    %47 = tpu.matmul %42, %44, %cst_44 {dimension_numbers = #tpu.dot_dimension_numbers<[1], [1], [0], [0], [0, 0, 1, 0], [], []>} : vector<8x8xf32>, vector<8x8xf32>, vector<8x8xf32> -> vector<8x8xf32>
    %c1 = arith.constant 1 : index
    %c0_45 = arith.constant 0 : index
    %c0_46 = arith.constant 0 : index
    %48 = vector.load %arg8[%c1, %c0_45, %c0_46] : memref<4x8x1xf32, #tpu.memory_space<vmem>>, vector<1x8x1xf32>
    %49 = vector.shape_cast %48 : vector<1x8x1xf32> to vector<8x1xf32>
    %cst_47 = arith.constant dense<0xFF800000> : vector<8xf32>
    %50 = vector.multi_reduction <maximumf>, %47, %cst_47 [1] : vector<8x8xf32> to vector<8xf32>
    %51 = vector.shape_cast %50 : vector<8xf32> to vector<8x1xf32>
    %52 = arith.maximumf %49, %51 : vector<8x1xf32>
    %53 = arith.subf %49, %52 : vector<8x1xf32>
    %54 = math.exp %53 : vector<8x1xf32>
    %55 = vector.broadcast %52 : vector<8x1xf32> to vector<8x8xf32>
    %56 = arith.subf %47, %55 : vector<8x8xf32>
    %57 = math.exp %56 : vector<8x8xf32>
    %c1_48 = arith.constant 1 : index
    %c0_49 = arith.constant 0 : index
    %c0_50 = arith.constant 0 : index
    %58 = vector.load %arg9[%c1_48, %c0_49, %c0_50] : memref<4x8x1xf32, #tpu.memory_space<vmem>>, vector<1x8x1xf32>
    %59 = vector.shape_cast %58 : vector<1x8x1xf32> to vector<8x1xf32>
    %60 = arith.mulf %54, %59 : vector<8x1xf32>
    %cst_51 = arith.constant dense<0.000000e+00> : vector<8xf32>
    %61 = vector.multi_reduction <add>, %57, %cst_51 [1] : vector<8x8xf32> to vector<8xf32>
    %62 = vector.shape_cast %61 : vector<8xf32> to vector<8x1xf32>
    %63 = arith.addf %60, %62 : vector<8x1xf32>
    %c1_52 = arith.constant 1 : index
    %c0_53 = arith.constant 0 : index
    %c0_54 = arith.constant 0 : index
    %64 = vector.load %arg9[%c1_52, %c0_53, %c0_54] : memref<4x8x1xf32, #tpu.memory_space<vmem>>, vector<1x8x1xf32>
    %65 = vector.shape_cast %64 : vector<1x8x1xf32> to vector<8x1xf32>
    %66 = vector.shape_cast %63 : vector<8x1xf32> to vector<1x8x1xf32>
    tpu.vector_store %arg9[%c1_52, %c0_53, %c0_54], %66 {strides = array<i32>} : memref<4x8x1xf32, #tpu.memory_space<vmem>>, vector<1x8x1xf32>,
    %c1_55 = arith.constant 1 : index
    %c0_56 = arith.constant 0 : index
    %c0_57 = arith.constant 0 : index
    %67 = vector.load %arg10[%c1_55, %c0_56, %c0_57] : memref<4x8x8xf32, #tpu.memory_space<vmem>>, vector<1x8x8xf32>
    %68 = vector.shape_cast %67 : vector<1x8x8xf32> to vector<8x8xf32>
    %69 = vector.broadcast %54 : vector<8x1xf32> to vector<8x8xf32>
    %70 = arith.mulf %69, %68 : vector<8x8xf32>
    %cst_58 = arith.constant dense<0.000000e+00> : vector<8x8xf32>
    %71 = tpu.matmul %57, %46, %cst_58 {dimension_numbers = #tpu.dot_dimension_numbers<[1], [0], [0], [1], [0, 0, 1, 1], [], []>} : vector<8x8xf32>, vector<8x8xf32>, vector<8x8xf32> -> vector<8x8xf32>
    %72 = arith.addf %70, %71 : vector<8x8xf32>
    %c1_59 = arith.constant 1 : index
    %c0_60 = arith.constant 0 : index
    %c0_61 = arith.constant 0 : index
    %73 = vector.load %arg10[%c1_59, %c0_60, %c0_61] : memref<4x8x8xf32, #tpu.memory_space<vmem>>, vector<1x8x8xf32>
    %74 = vector.shape_cast %73 : vector<1x8x8xf32> to vector<8x8xf32>
    %75 = vector.shape_cast %72 : vector<8x8xf32> to vector<1x8x8xf32>
    tpu.vector_store %arg10[%c1_59, %c0_60, %c0_61], %75 {strides = array<i32>} : memref<4x8x8xf32, #tpu.memory_space<vmem>>, vector<1x8x8xf32>,
    %c1_62 = arith.constant 1 : index
    %c0_63 = arith.constant 0 : index
    %c0_64 = arith.constant 0 : index
    %76 = vector.load %arg8[%c1_62, %c0_63, %c0_64] : memref<4x8x1xf32, #tpu.memory_space<vmem>>, vector<1x8x1xf32>
    %77 = vector.shape_cast %76 : vector<1x8x1xf32> to vector<8x1xf32>
    %78 = vector.shape_cast %52 : vector<8x1xf32> to vector<1x8x1xf32>
    tpu.vector_store %arg8[%c1_62, %c0_63, %c0_64], %78 {strides = array<i32>} : memref<4x8x1xf32, #tpu.memory_space<vmem>>, vector<1x8x1xf32>,
    %c0_65 = arith.constant 0 : index
    %c0_66 = arith.constant 0 : index
    %c0_67 = arith.constant 0 : index
    %c16 = arith.constant 16 : index
    %79 = vector.load %arg4[%c0_65, %c0_66, %c0_67, %c16] : memref<1x1x8x32xf32, #tpu.memory_space<vmem>>, vector<1x1x8x8xf32>
    %80 = vector.shape_cast %79 : vector<1x1x8x8xf32> to vector<8x8xf32>
    %c0_68 = arith.constant 0 : index
    %c0_69 = arith.constant 0 : index
    %c0_70 = arith.constant 0 : index
    %c16_71 = arith.constant 16 : index
    %81 = vector.load %arg5[%c0_68, %c0_69, %c0_70, %c16_71] : memref<1x1x8x32xf32, #tpu.memory_space<vmem>>, vector<1x1x8x8xf32>
    %82 = vector.shape_cast %81 : vector<1x1x8x8xf32> to vector<8x8xf32>
    %c0_72 = arith.constant 0 : index
    %c0_73 = arith.constant 0 : index
    %c0_74 = arith.constant 0 : index
    %c16_75 = arith.constant 16 : index
    %83 = vector.load %arg6[%c0_72, %c0_73, %c0_74, %c16_75] : memref<1x1x8x32xf32, #tpu.memory_space<vmem>>, vector<1x1x8x8xf32>
    %84 = vector.shape_cast %83 : vector<1x1x8x8xf32> to vector<8x8xf32>
    %cst_76 = arith.constant dense<0.000000e+00> : vector<8x8xf32>
    %85 = tpu.matmul %80, %82, %cst_76 {dimension_numbers = #tpu.dot_dimension_numbers<[1], [1], [0], [0], [0, 0, 1, 0], [], []>} : vector<8x8xf32>, vector<8x8xf32>, vector<8x8xf32> -> vector<8x8xf32>
    %c2 = arith.constant 2 : index
    %c0_77 = arith.constant 0 : index
    %c0_78 = arith.constant 0 : index
    %86 = vector.load %arg8[%c2, %c0_77, %c0_78] : memref<4x8x1xf32, #tpu.memory_space<vmem>>, vector<1x8x1xf32>
    %87 = vector.shape_cast %86 : vector<1x8x1xf32> to vector<8x1xf32>
    %cst_79 = arith.constant dense<0xFF800000> : vector<8xf32>
    %88 = vector.multi_reduction <maximumf>, %85, %cst_79 [1] : vector<8x8xf32> to vector<8xf32>
    %89 = vector.shape_cast %88 : vector<8xf32> to vector<8x1xf32>
    %90 = arith.maximumf %87, %89 : vector<8x1xf32>
    %91 = arith.subf %87, %90 : vector<8x1xf32>
    %92 = math.exp %91 : vector<8x1xf32>
    %93 = vector.broadcast %90 : vector<8x1xf32> to vector<8x8xf32>
    %94 = arith.subf %85, %93 : vector<8x8xf32>
    %95 = math.exp %94 : vector<8x8xf32>
    %c2_80 = arith.constant 2 : index
    %c0_81 = arith.constant 0 : index
    %c0_82 = arith.constant 0 : index
    %96 = vector.load %arg9[%c2_80, %c0_81, %c0_82] : memref<4x8x1xf32, #tpu.memory_space<vmem>>, vector<1x8x1xf32>
    %97 = vector.shape_cast %96 : vector<1x8x1xf32> to vector<8x1xf32>
    %98 = arith.mulf %92, %97 : vector<8x1xf32>
    %cst_83 = arith.constant dense<0.000000e+00> : vector<8xf32>
    %99 = vector.multi_reduction <add>, %95, %cst_83 [1] : vector<8x8xf32> to vector<8xf32>
    %100 = vector.shape_cast %99 : vector<8xf32> to vector<8x1xf32>
    %101 = arith.addf %98, %100 : vector<8x1xf32>
    %c2_84 = arith.constant 2 : index
    %c0_85 = arith.constant 0 : index
    %c0_86 = arith.constant 0 : index
    %102 = vector.load %arg9[%c2_84, %c0_85, %c0_86] : memref<4x8x1xf32, #tpu.memory_space<vmem>>, vector<1x8x1xf32>
    %103 = vector.shape_cast %102 : vector<1x8x1xf32> to vector<8x1xf32>
    %104 = vector.shape_cast %101 : vector<8x1xf32> to vector<1x8x1xf32>
    tpu.vector_store %arg9[%c2_84, %c0_85, %c0_86], %104 {strides = array<i32>} : memref<4x8x1xf32, #tpu.memory_space<vmem>>, vector<1x8x1xf32>,
    %c2_87 = arith.constant 2 : index
    %c0_88 = arith.constant 0 : index
    %c0_89 = arith.constant 0 : index
    %105 = vector.load %arg10[%c2_87, %c0_88, %c0_89] : memref<4x8x8xf32, #tpu.memory_space<vmem>>, vector<1x8x8xf32>
    %106 = vector.shape_cast %105 : vector<1x8x8xf32> to vector<8x8xf32>
    %107 = vector.broadcast %92 : vector<8x1xf32> to vector<8x8xf32>
    %108 = arith.mulf %107, %106 : vector<8x8xf32>
    %cst_90 = arith.constant dense<0.000000e+00> : vector<8x8xf32>
    %109 = tpu.matmul %95, %84, %cst_90 {dimension_numbers = #tpu.dot_dimension_numbers<[1], [0], [0], [1], [0, 0, 1, 1], [], []>} : vector<8x8xf32>, vector<8x8xf32>, vector<8x8xf32> -> vector<8x8xf32>
    %110 = arith.addf %108, %109 : vector<8x8xf32>
    %c2_91 = arith.constant 2 : index
    %c0_92 = arith.constant 0 : index
    %c0_93 = arith.constant 0 : index
    %111 = vector.load %arg10[%c2_91, %c0_92, %c0_93] : memref<4x8x8xf32, #tpu.memory_space<vmem>>, vector<1x8x8xf32>
    %112 = vector.shape_cast %111 : vector<1x8x8xf32> to vector<8x8xf32>
    %113 = vector.shape_cast %110 : vector<8x8xf32> to vector<1x8x8xf32>
    tpu.vector_store %arg10[%c2_91, %c0_92, %c0_93], %113 {strides = array<i32>} : memref<4x8x8xf32, #tpu.memory_space<vmem>>, vector<1x8x8xf32>,
    %c2_94 = arith.constant 2 : index
    %c0_95 = arith.constant 0 : index
    %c0_96 = arith.constant 0 : index
    %114 = vector.load %arg8[%c2_94, %c0_95, %c0_96] : memref<4x8x1xf32, #tpu.memory_space<vmem>>, vector<1x8x1xf32>
    %115 = vector.shape_cast %114 : vector<1x8x1xf32> to vector<8x1xf32>
    %116 = vector.shape_cast %90 : vector<8x1xf32> to vector<1x8x1xf32>
    tpu.vector_store %arg8[%c2_94, %c0_95, %c0_96], %116 {strides = array<i32>} : memref<4x8x1xf32, #tpu.memory_space<vmem>>, vector<1x8x1xf32>,
    %c0_97 = arith.constant 0 : index
    %c0_98 = arith.constant 0 : index
    %c0_99 = arith.constant 0 : index
    %c24 = arith.constant 24 : index
    %117 = vector.load %arg4[%c0_97, %c0_98, %c0_99, %c24] : memref<1x1x8x32xf32, #tpu.memory_space<vmem>>, vector<1x1x8x8xf32>
    %118 = vector.shape_cast %117 : vector<1x1x8x8xf32> to vector<8x8xf32>
    %c0_100 = arith.constant 0 : index
    %c0_101 = arith.constant 0 : index
    %c0_102 = arith.constant 0 : index
    %c24_103 = arith.constant 24 : index
    %119 = vector.load %arg5[%c0_100, %c0_101, %c0_102, %c24_103] : memref<1x1x8x32xf32, #tpu.memory_space<vmem>>, vector<1x1x8x8xf32>
    %120 = vector.shape_cast %119 : vector<1x1x8x8xf32> to vector<8x8xf32>
    %c0_104 = arith.constant 0 : index
    %c0_105 = arith.constant 0 : index
    %c0_106 = arith.constant 0 : index
    %c24_107 = arith.constant 24 : index
    %121 = vector.load %arg6[%c0_104, %c0_105, %c0_106, %c24_107] : memref<1x1x8x32xf32, #tpu.memory_space<vmem>>, vector<1x1x8x8xf32>
    %122 = vector.shape_cast %121 : vector<1x1x8x8xf32> to vector<8x8xf32>
    %cst_108 = arith.constant dense<0.000000e+00> : vector<8x8xf32>
    %123 = tpu.matmul %118, %120, %cst_108 {dimension_numbers = #tpu.dot_dimension_numbers<[1], [1], [0], [0], [0, 0, 1, 0], [], []>} : vector<8x8xf32>, vector<8x8xf32>, vector<8x8xf32> -> vector<8x8xf32>
    %c3 = arith.constant 3 : index
    %c0_109 = arith.constant 0 : index
    %c0_110 = arith.constant 0 : index
    %124 = vector.load %arg8[%c3, %c0_109, %c0_110] : memref<4x8x1xf32, #tpu.memory_space<vmem>>, vector<1x8x1xf32>
    %125 = vector.shape_cast %124 : vector<1x8x1xf32> to vector<8x1xf32>
    %cst_111 = arith.constant dense<0xFF800000> : vector<8xf32>
    %126 = vector.multi_reduction <maximumf>, %123, %cst_111 [1] : vector<8x8xf32> to vector<8xf32>
    %127 = vector.shape_cast %126 : vector<8xf32> to vector<8x1xf32>
    %128 = arith.maximumf %125, %127 : vector<8x1xf32>
    %129 = arith.subf %125, %128 : vector<8x1xf32>
    %130 = math.exp %129 : vector<8x1xf32>
    %131 = vector.broadcast %128 : vector<8x1xf32> to vector<8x8xf32>
    %132 = arith.subf %123, %131 : vector<8x8xf32>
    %133 = math.exp %132 : vector<8x8xf32>
    %c3_112 = arith.constant 3 : index
    %c0_113 = arith.constant 0 : index
    %c0_114 = arith.constant 0 : index
    %134 = vector.load %arg9[%c3_112, %c0_113, %c0_114] : memref<4x8x1xf32, #tpu.memory_space<vmem>>, vector<1x8x1xf32>
    %135 = vector.shape_cast %134 : vector<1x8x1xf32> to vector<8x1xf32>
    %136 = arith.mulf %130, %135 : vector<8x1xf32>
    %cst_115 = arith.constant dense<0.000000e+00> : vector<8xf32>
    %137 = vector.multi_reduction <add>, %133, %cst_115 [1] : vector<8x8xf32> to vector<8xf32>
    %138 = vector.shape_cast %137 : vector<8xf32> to vector<8x1xf32>
    %139 = arith.addf %136, %138 : vector<8x1xf32>
    %c3_116 = arith.constant 3 : index
    %c0_117 = arith.constant 0 : index
    %c0_118 = arith.constant 0 : index
    %140 = vector.load %arg9[%c3_116, %c0_117, %c0_118] : memref<4x8x1xf32, #tpu.memory_space<vmem>>, vector<1x8x1xf32>
    %141 = vector.shape_cast %140 : vector<1x8x1xf32> to vector<8x1xf32>
    %142 = vector.shape_cast %139 : vector<8x1xf32> to vector<1x8x1xf32>
    tpu.vector_store %arg9[%c3_116, %c0_117, %c0_118], %142 {strides = array<i32>} : memref<4x8x1xf32, #tpu.memory_space<vmem>>, vector<1x8x1xf32>,
    %c3_119 = arith.constant 3 : index
    %c0_120 = arith.constant 0 : index
    %c0_121 = arith.constant 0 : index
    %143 = vector.load %arg10[%c3_119, %c0_120, %c0_121] : memref<4x8x8xf32, #tpu.memory_space<vmem>>, vector<1x8x8xf32>
    %144 = vector.shape_cast %143 : vector<1x8x8xf32> to vector<8x8xf32>
    %145 = vector.broadcast %130 : vector<8x1xf32> to vector<8x8xf32>
    %146 = arith.mulf %145, %144 : vector<8x8xf32>
    %cst_122 = arith.constant dense<0.000000e+00> : vector<8x8xf32>
    %147 = tpu.matmul %133, %122, %cst_122 {dimension_numbers = #tpu.dot_dimension_numbers<[1], [0], [0], [1], [0, 0, 1, 1], [], []>} : vector<8x8xf32>, vector<8x8xf32>, vector<8x8xf32> -> vector<8x8xf32>
    %148 = arith.addf %146, %147 : vector<8x8xf32>
    %c3_123 = arith.constant 3 : index
    %c0_124 = arith.constant 0 : index
    %c0_125 = arith.constant 0 : index
    %149 = vector.load %arg10[%c3_123, %c0_124, %c0_125] : memref<4x8x8xf32, #tpu.memory_space<vmem>>, vector<1x8x8xf32>
    %150 = vector.shape_cast %149 : vector<1x8x8xf32> to vector<8x8xf32>
    %151 = vector.shape_cast %148 : vector<8x8xf32> to vector<1x8x8xf32>
    tpu.vector_store %arg10[%c3_123, %c0_124, %c0_125], %151 {strides = array<i32>} : memref<4x8x8xf32, #tpu.memory_space<vmem>>, vector<1x8x8xf32>,
    %c3_126 = arith.constant 3 : index
    %c0_127 = arith.constant 0 : index
    %c0_128 = arith.constant 0 : index
    %152 = vector.load %arg8[%c3_126, %c0_127, %c0_128] : memref<4x8x1xf32, #tpu.memory_space<vmem>>, vector<1x8x1xf32>
    %153 = vector.shape_cast %152 : vector<1x8x1xf32> to vector<8x1xf32>
    %154 = vector.shape_cast %128 : vector<8x1xf32> to vector<1x8x1xf32>
    tpu.vector_store %arg8[%c3_126, %c0_127, %c0_128], %154 {strides = array<i32>} : memref<4x8x1xf32, #tpu.memory_space<vmem>>, vector<1x8x1xf32>,
    %c0_i32_129 = arith.constant 0 : i32
    %155 = arith.cmpi eq, %arg3, %c0_i32_129 : i32
    %156 = arith.extui %155 : i1 to i32
    %c0_i32_130 = arith.constant 0 : i32
    %157 = arith.cmpi ne, %156, %c0_i32_130 : i32
    scf.if %157 {
      %c0_131 = arith.constant 0 : index
      %c0_132 = arith.constant 0 : index
      %c0_133 = arith.constant 0 : index
      %158 = vector.load %arg9[%c0_131, %c0_132, %c0_133] : memref<4x8x1xf32, #tpu.memory_space<vmem>>, vector<1x8x1xf32>
      %159 = vector.shape_cast %158 : vector<1x8x1xf32> to vector<8x1xf32>
      %160 = tpu.reciprocal %159 : vector<8x1xf32> -> vector<8x1xf32>
      %c0_134 = arith.constant 0 : index
      %c0_135 = arith.constant 0 : index
      %c0_136 = arith.constant 0 : index
      %161 = vector.load %arg10[%c0_134, %c0_135, %c0_136] : memref<4x8x8xf32, #tpu.memory_space<vmem>>, vector<1x8x8xf32>
      %162 = vector.shape_cast %161 : vector<1x8x8xf32> to vector<8x8xf32>
      %163 = vector.broadcast %160 : vector<8x1xf32> to vector<8x8xf32>
      %164 = arith.mulf %162, %163 : vector<8x8xf32>
      %c0_137 = arith.constant 0 : index
      %c0_138 = arith.constant 0 : index
      %c0_139 = arith.constant 0 : index
      %165 = vector.load %arg7[%c0_137, %c0_138, %c0_139] : memref<1x8x32xf32, #tpu.memory_space<vmem>>, vector<1x8x8xf32>
      %166 = vector.shape_cast %165 : vector<1x8x8xf32> to vector<8x8xf32>
      %167 = vector.shape_cast %164 : vector<8x8xf32> to vector<1x8x8xf32>
      tpu.vector_store %arg7[%c0_137, %c0_138, %c0_139], %167 {strides = array<i32>} : memref<1x8x32xf32, #tpu.memory_space<vmem>>, vector<1x8x8xf32>,
      %c1_140 = arith.constant 1 : index
      %c0_141 = arith.constant 0 : index
      %c0_142 = arith.constant 0 : index
      %168 = vector.load %arg9[%c1_140, %c0_141, %c0_142] : memref<4x8x1xf32, #tpu.memory_space<vmem>>, vector<1x8x1xf32>
      %169 = vector.shape_cast %168 : vector<1x8x1xf32> to vector<8x1xf32>
      %170 = tpu.reciprocal %169 : vector<8x1xf32> -> vector<8x1xf32>
      %c1_143 = arith.constant 1 : index
      %c0_144 = arith.constant 0 : index
      %c0_145 = arith.constant 0 : index
      %171 = vector.load %arg10[%c1_143, %c0_144, %c0_145] : memref<4x8x8xf32, #tpu.memory_space<vmem>>, vector<1x8x8xf32>
      %172 = vector.shape_cast %171 : vector<1x8x8xf32> to vector<8x8xf32>
      %173 = vector.broadcast %170 : vector<8x1xf32> to vector<8x8xf32>
      %174 = arith.mulf %172, %173 : vector<8x8xf32>
      %c0_146 = arith.constant 0 : index
      %c0_147 = arith.constant 0 : index
      %c8_148 = arith.constant 8 : index
      %175 = vector.load %arg7[%c0_146, %c0_147, %c8_148] : memref<1x8x32xf32, #tpu.memory_space<vmem>>, vector<1x8x8xf32>
      %176 = vector.shape_cast %175 : vector<1x8x8xf32> to vector<8x8xf32>
      %177 = vector.shape_cast %174 : vector<8x8xf32> to vector<1x8x8xf32>
      tpu.vector_store %arg7[%c0_146, %c0_147, %c8_148], %177 {strides = array<i32>} : memref<1x8x32xf32, #tpu.memory_space<vmem>>, vector<1x8x8xf32>,
      %c2_149 = arith.constant 2 : index
      %c0_150 = arith.constant 0 : index
      %c0_151 = arith.constant 0 : index
      %178 = vector.load %arg9[%c2_149, %c0_150, %c0_151] : memref<4x8x1xf32, #tpu.memory_space<vmem>>, vector<1x8x1xf32>
      %179 = vector.shape_cast %178 : vector<1x8x1xf32> to vector<8x1xf32>
      %180 = tpu.reciprocal %179 : vector<8x1xf32> -> vector<8x1xf32>
      %c2_152 = arith.constant 2 : index
      %c0_153 = arith.constant 0 : index
      %c0_154 = arith.constant 0 : index
      %181 = vector.load %arg10[%c2_152, %c0_153, %c0_154] : memref<4x8x8xf32, #tpu.memory_space<vmem>>, vector<1x8x8xf32>
      %182 = vector.shape_cast %181 : vector<1x8x8xf32> to vector<8x8xf32>
      %183 = vector.broadcast %180 : vector<8x1xf32> to vector<8x8xf32>
      %184 = arith.mulf %182, %183 : vector<8x8xf32>
      %c0_155 = arith.constant 0 : index
      %c0_156 = arith.constant 0 : index
      %c16_157 = arith.constant 16 : index
      %185 = vector.load %arg7[%c0_155, %c0_156, %c16_157] : memref<1x8x32xf32, #tpu.memory_space<vmem>>, vector<1x8x8xf32>
      %186 = vector.shape_cast %185 : vector<1x8x8xf32> to vector<8x8xf32>
      %187 = vector.shape_cast %184 : vector<8x8xf32> to vector<1x8x8xf32>
      tpu.vector_store %arg7[%c0_155, %c0_156, %c16_157], %187 {strides = array<i32>} : memref<1x8x32xf32, #tpu.memory_space<vmem>>, vector<1x8x8xf32>,
      %c3_158 = arith.constant 3 : index
      %c0_159 = arith.constant 0 : index
      %c0_160 = arith.constant 0 : index
      %188 = vector.load %arg9[%c3_158, %c0_159, %c0_160] : memref<4x8x1xf32, #tpu.memory_space<vmem>>, vector<1x8x1xf32>
      %189 = vector.shape_cast %188 : vector<1x8x1xf32> to vector<8x1xf32>
      %190 = tpu.reciprocal %189 : vector<8x1xf32> -> vector<8x1xf32>
      %c3_161 = arith.constant 3 : index
      %c0_162 = arith.constant 0 : index
      %c0_163 = arith.constant 0 : index
      %191 = vector.load %arg10[%c3_161, %c0_162, %c0_163] : memref<4x8x8xf32, #tpu.memory_space<vmem>>, vector<1x8x8xf32>
      %192 = vector.shape_cast %191 : vector<1x8x8xf32> to vector<8x8xf32>
      %193 = vector.broadcast %190 : vector<8x1xf32> to vector<8x8xf32>
      %194 = arith.mulf %192, %193 : vector<8x8xf32>
      %c0_164 = arith.constant 0 : index
      %c0_165 = arith.constant 0 : index
      %c24_166 = arith.constant 24 : index
      %195 = vector.load %arg7[%c0_164, %c0_165, %c24_166] : memref<1x8x32xf32, #tpu.memory_space<vmem>>, vector<1x8x8xf32>
      %196 = vector.shape_cast %195 : vector<1x8x8xf32> to vector<8x8xf32>
      %197 = vector.shape_cast %194 : vector<8x8xf32> to vector<1x8x8xf32>
      tpu.vector_store %arg7[%c0_164, %c0_165, %c24_166], %197 {strides = array<i32>} : memref<1x8x32xf32, #tpu.memory_space<vmem>>, vector<1x8x8xf32>,
    } else {
    }
    return
  }
  func.func @transform_0(%arg0: i32, %arg1: i32, %arg2: i32, %arg3: i32) -> (i32, i32, i32, i32) {
    %c0_i32 = arith.constant 0 : i32
    %c0_i32_0 = arith.constant 0 : i32
    return %c0_i32, %arg0, %arg1, %arg2 : i32, i32, i32, i32
  }
  func.func @transform_1(%arg0: i32, %arg1: i32, %arg2: i32, %arg3: i32) -> (i32, i32, i32, i32) {
    %c1_i32 = arith.constant 1 : i32
    %c0_i32 = arith.constant 0 : i32
    return %c1_i32, %arg0, %arg3, %arg2 : i32, i32, i32, i32
  }
  func.func @transform_2(%arg0: i32, %arg1: i32, %arg2: i32, %arg3: i32) -> (i32, i32, i32, i32) {
    %c2_i32 = arith.constant 2 : i32
    %c0_i32 = arith.constant 0 : i32
    return %c2_i32, %arg0, %arg3, %arg2 : i32, i32, i32, i32
  }
  func.func @transform_3(%arg0: i32, %arg1: i32, %arg2: i32, %arg3: i32) -> (i32, i32, i32) {
    %c0_i32 = arith.constant 0 : i32
    return %arg0, %arg1, %arg2 : i32, i32, i32
  }
}

</mosaic_0001>

<bundles_post_ra>
// kernel: parallel_mha_forward.3
= control target key start
LH: loop header
LB: loop body
LE: loop exit
PB: predicated region body
PF: predicated region fallthrough
CT: control target
= control target key end

     0   :  { %8 = vsyncpa [#allocation4], 0  ;;  %s910_s0 = inlined_call_operand.vmem [shape: f32[16,32], index: 0, kind: input, shape index: {}]   ;;  %s911_s1 = inlined_call_operand.hbm [shape: f32[3,32,32], index: 1, kind: input, shape index: {}]   ;;  %s912_s2 = inlined_call_operand.vmem [shape: f32[3,1,32], index: 2, kind: input, shape index: {}]   ;;  %s913_s3 = inlined_call_operand.vmem [shape: f32[3,16,32], index: 3, kind: output, shape index: {}]  }
   0x1   :  { %10 = vsyncpa [#allocation4 + $0x1], 0  ;;  %s769_s12 = smov 0   ;;  %s771_s13 = smov 0  }
   0x2   :  { %s773_s14 = smov 0   ;;  %s775_s15 = smov 0  }
   0x3   :  { %s777_s16 = smov 0   ;;  %s779_s17 = smov 0  }
   0x4 LB: > { %s561_s18 = sadd.s32 4294967295, %s743_s17   ;;  %s42_s19 = sadd.s32 1, %s739_s16  ;;  %s743_s17 = sphi %s779_s17, %s16_s17   ;;  %s739_s16 = sphi %s777_s16, %s921_s16   ;;  %s735_s15 = sphi %s775_s15, %s920_s15   ;;  %s731_s14 = sphi %s773_s14, %s919_s14   ;;  %s727_s13 = sphi %s771_s13, %s918_s13   ;;  %s723_s12 = sphi %s769_s12, %s917_s12  }
   0x5   : > { %p44_p0 = scmp.ge.s32.totalorder %s42_s19, 3  ;;  %s81_s20 = sadd.s32 1, %s731_s14 }
   0x6   : > { %p88_p1 = scmp.ne.s32.totalorder %s731_s14, %s727_s13  ;;  %p89_p2 = scmp.eq.s32.totalorder %s743_s17, 0 }
   0x7   : > { %s923_s19 = smov (%p44_p0, %s42_s19), 0  ;;  %p94_p4 = scmp.ne.s32.totalorder %s727_s13, %s723_s12 }
   0x8   : > { %p805_p3 = por %p89_p2, %p88_p1  ;;  %s74_s22 = ssub.s32 %s739_s16, %s923_s19 }
   0x9   : > { %p95_p5 = scmp.eq.s32.totalorder %s561_s18, 0  ;;  %p79_p6 = scmp.eq.s32.totalorder %s74_s22, 0 }
   0xa   : > { %p611_p8 = scmp.lt.s32.totalorder %s743_s17, 3  ;;  %s188_s25 = sand.u32 1, %s731_s14  }
   0xb   : > { %p812_p7 = por %p95_p5, %p94_p4  ;;  %s578_s26 = sshll.u32 %s739_s16, 9 }
   0xc   : > { %s818_s24 = scalar_select %p79_p6, %s731_s14, %s81_s20  }
   0xd   : > { %s566_s27 = sshll.u32 %s188_s25, 5  ;;  %s825_s30 = scalar_lea.hbm %s911_s1, %s578_s26 }
   0xe   : > { %s192_s4 = scalar_lea.vmem [#allocation3], %s566_s27  ;;  %p829_p9 = pnand %p611_p8, %p805_p3 }
   0xf   : > { %s202_s5 = sshll.u32 %s192_s4, 4  ;;  %s835_s7 = scalar_lea.sflag [#allocation4], %s188_s25  ;;  %s833_s5 = int_to_ptr.vmem [resolvable:$true] %s202_s5 }
  0x10   : > { %s663_s8 = scalar_lea.hbm %s825_s30, 512  ;;  %p665_p11 = pneg %p829_p9 }
  0x11   : > { %p664_p10 = scmp.ne.s32.totalorder %s825_s30, %s663_s8  ;;  %s668_s11 = scalar_lea.hbm %s911_s1, 1536 }
  0x12   : > { %p669_p0 = scmp.lt.u32.totalorder %s825_s30, %s911_s1  ;;  %p670_p1 = scmp.lt.u32.totalorder %s668_s11, %s663_s8 }
  0x13   : > { %p666_p12 = pnand %p665_p11, %p664_p10  ;;  %p672_p3 = scmp.lt.u32.totalorder %s663_s8, %s825_s30 }
  0x14   : > { %p671_p2 = por %p670_p1, %p669_p0 }
  0x15   : > { %p667_p13 = pneg %p666_p12 }
  0x16   : > { %p673_p4 = por %p672_p3, %p671_p2 }
  0x18   : > { %p674_p5 = pnand %p673_p4, %p667_p13 }
  0x1a   : > { %677 = shalt.err (!%p674_p5)
}
  0x1b   : > { %s678_s20 = scalar_lea.vmem %s833_s5, 512  ;;  %s745_s21 = smov [#allocation3]  }
  0x1c   : > { %p679_p6 = scmp.ne.s32.totalorder %s833_s5, %s678_s20  ;;  %s683_s22 = sshll.u32 %s745_s21, 4  ;;  %s684_s22 = int_to_ptr.vmem [resolvable:$false] %s683_s22 }
  0x1d   : > { %s685_s25 = scalar_lea.vmem %s684_s22, 1024  ;;  %p686_p12 = scmp.lt.s32.totalorder %s833_s5, %s684_s22 }
  0x1e   : > { %p681_p8 = pnand %p679_p6, %p665_p11  ;;  %p687_p0 = scmp.lt.s32.totalorder %s685_s25, %s678_s20 }
  0x20   : > { %p682_p10 = pneg %p681_p8  ;;  %p688_p1 = por %p687_p0, %p686_p12 }
  0x22   : > { %p689_p2 = pnand %p688_p1, %p682_p10 }
  0x24   : > { %692 = shalt.err (!%p689_p2)
}
  0x25   : > { %s746_s26 = smov 128   ;;  %s747_s27 = smov 8  }
  0x26   : > { %610 = dma.hbm_to_vmem [thread:$0]  (!%p829_p9), %s825_s30, 512, %s833_s5, %s835_s7, %s746_s26, %s746_s26, %s747_s27  }
  0x27   : > { %p569_p11 = scmp.ge.s32.totalorder %s743_s17, 1  ;;  %p219_p13 = scmp.lt.s32.totalorder %s743_s17, 4 }
  0x29   : > { %p220_p3 = pnand %p569_p11, %p219_p13 }
  0x2a   : > { %s225_s28 = sand.u32 (!%p220_p3), 1, %s727_s13  }
  0x2b   : > { %223 = sbr.rel (%p220_p3) target bundleno = 288 (0x120), region = 32  ;;  %s570_s29 = sshll.u32 (!%p220_p3), %s225_s28, 5 }
  0x2c   : > { %s226_s4 = scalar_lea.sflag (!%p220_p3), [#allocation4], %s225_s28  ;;  %s229_s8 = scalar_lea.vmem (!%p220_p3), [#allocation3], %s570_s29 }
  0x32   : > { %718 = dma.done.wait (%p812_p7), %s226_s4, 512  }
  0x33   : > { %720 = vsyncadd (%p812_p7), %s226_s4, 4294966784  ;;  %vm306_vm0 = vcmask 261120   ;;  %v748_v0 = vmov 0.0   ;;  %v313_v1 = vld [vmem:[%s229_s8] sm:$0xff]  ;;  %v314_v2 = vld [vmem:[%s229_s8 + $0x8] sm:$0xff]  ;;  %p283_p7 = scmp.lt.s32.totalorder %s735_s15, 2 }
  0x34   : > { %308 = vst.msk [vmem:[#allocation2 + $0x8] sm:$0xff] %vm306_vm0, %v748_v0  ;;  %307 = vst.msk [vmem:[#allocation2] sm:$0xff] %vm306_vm0, %v748_v0  ;;  %v315_v3 = vld [vmem:[%s229_s8 + $0x10] sm:$0xff]  ;;  %v597_v4 = vpack.c.bf16 %v314_v2, %v313_v1  ;;  %v316_v5 = vld [vmem:[%s229_s8 + $0x18] sm:$0xff] }
  0x35   : > { %v311_v6 = vld [vmem:[%s910_s0] sm:$0xff]  ;;  %v601_v7 = vpack.c.bf16 %v316_v5, %v315_v3  ;;  %v312_v8 = vld [vmem:[%s910_s0 + $0x8] sm:$0xff]  ;;  %s925_s15 = smov (!%p283_p7, %s735_s15), 2 }
  0x36   : > { %594 = vmatprep.mubr.msk.f32.mxu0 %vm306_vm0, %v311_v6  ;;  %598 = vmatprep.subr.bf16.mxu0 %v597_v4  ;;  %s288_s10 = scalar_lea.vmem %s912_s2, %s925_s15  ;;  %s579_s11 = sshll.u32 %s925_s15, 4 }
  0x37   : > { %600 = vmatpush3.bf16.msra.mxu0 %v597_v4  ;;  %v575_v15 = vld [vmem:[%s288_s10] ss:$0 sm:$0xff]  ;;  %s300_s20 = scalar_lea.vmem %s913_s3, %s579_s11 }
  0x38   : > { %602 = vmatprep.subr.bf16.mxu0 %v601_v7 }
  0x3b   : > { %604 = vmatpush3.bf16.msra.mxu0 %v601_v7  ;;  %v310_v9 = vld [vmem:[#allocation2 + $0x8] sm:$0xff]  ;;  %v309_v10 = vld [vmem:[#allocation2] sm:$0xff] }
  0x3e   : > { %595 = vmatmul.mubr.msk.f32.vlgmr.msra.gmra.mrb[0].mxu0 %vm306_vm0, %v312_v8 }
 0x111   : > { %v596_v11 = vpop.f32.mrb[0].mxu0 }
 0x112   : > { %v400_v12 = vadd.f32 %v596_v11, %v310_v9  ;;  %v390_v13 = vpop.f32.mrb[1].mxu0 }
 0x113   : > { %v399_v14 = vadd.f32 %v390_v13, %v309_v10 }
 0x114   : > { %402 = vst.msk [vmem:[#allocation2 + $0x8] sm:$0xff] %vm306_vm0, %v400_v12 }
 0x115   : > { %401 = vst.msk [vmem:[#allocation2] sm:$0xff] %vm306_vm0, %v399_v14 }
 0x11b   : > { %v407_v16 = vld [vmem:[#allocation2 + $0x8] sm:$0xff] }
 0x11c   : > { %v416_v17 = vadd.f32 %v575_v15, %v407_v16  ;;  %v406_v18 = vld [vmem:[#allocation2] sm:$0xff] }
 0x11d   : > { %v415_v19 = vadd.f32 %v575_v15, %v406_v18 }
 0x11e   : > { %418 = vst.msk [vmem:[%s300_s20 + $0x8] sm:$0xff] %vm306_vm0, %v416_v17 }
 0x11f   : > { %417 = vst.msk [vmem:[%s300_s20] sm:$0xff] %vm306_vm0, %v415_v19 }
 0x120 PF: > { %s16_s17 = sadd.s32 1, %s743_s17   ;;  %s917_s12 = smov %s727_s13 }
 0x121   : > { %p13_p9 = scmp.ge.s32.totalorder %s16_s17, 5   ;;  %s918_s13 = smov %s731_s14 }
 0x122   : > { %s919_s14 = smov %s818_s24  ;;  %s920_s15 = smov %s739_s16 }
 0x123   : > { %s921_s16 = smov %s923_s19  ;;  %15 = sbr.rel (!%p13_p9) target bundleno = 4 (0x4), region = 86 }
 0x12a   :  { %455 = vsyncpa [#allocation4], 1 }
 0x12b   :  { %457 = vsyncpa [#allocation4 + $0x1], 1 }

// kernel: parallel_mha_forward.5
= control target key start
LH: loop header
LB: loop body
LE: loop exit
PB: predicated region body
PF: predicated region fallthrough
CT: control target
= control target key end

     0   :  { %vm19_vm0 = vcmask 261120   ;;  %v204_v6 = vmov 0.0   ;;  %s269_s0 = inlined_call_operand.vmem [shape: f32[16,32], index: 0, kind: input, shape index: {}]   ;;  %s270_s1 = inlined_call_operand.vmem [shape: f32[32,32], index: 1, kind: input, shape index: {}]   ;;  %s271_s2 = inlined_call_operand.vmem [shape: f32[1,32], index: 2, kind: input, shape index: {}]   ;;  %s272_s3 = inlined_call_operand.hbm [shape: f32[16,32], index: 3, kind: output, shape index: {}]  }
   0x1   :  { %v26_v0 = vld [vmem:[%s270_s1] sm:$0xff]  ;;  %v27_v1 = vld [vmem:[%s270_s1 + $0x8] sm:$0xff]  ;;  %v28_v2 = vld [vmem:[%s270_s1 + $0x10] sm:$0xff]  ;;  %21 = vst.msk [vmem:[#allocation2 + $0x8] sm:$0xff] %vm19_vm0, %v204_v6 }
   0x2   :  { %v168_v3 = vpack.c.bf16 %v27_v1, %v26_v0  ;;  %v29_v4 = vld [vmem:[%s270_s1 + $0x18] sm:$0xff]  ;;  %v24_v5 = vld [vmem:[%s269_s0] sm:$0xff]  ;;  %20 = vst.msk [vmem:[#allocation2] sm:$0xff] %vm19_vm0, %v204_v6 }
   0x3   :  { %v172_v7 = vpack.c.bf16 %v29_v4, %v28_v2  ;;  %165 = vmatprep.mubr.msk.f32.mxu0 %vm19_vm0, %v24_v5 }
   0x4   :  { %8 = vsyncpa [#allocation4], 0  ;;  %169 = vmatprep.subr.bf16.mxu0 %v168_v3  ;;  %v25_v8 = vld [vmem:[%s269_s0 + $0x8] sm:$0xff]  ;;  %v150_v15 = vld [vmem:[%s271_s2] ss:$0 sm:$0xff]  ;;  %s205_s25 = smov [#allocation3]  }
   0x5   :  { %171 = vmatpush3.bf16.msra.mxu0 %v168_v3  ;;  %s137_s26 = sshll.u32 %s205_s25, 4  ;;  %s138_s26 = int_to_ptr.vmem [resolvable:$true] %s137_s26 }
   0x6   :  { %173 = vmatprep.subr.bf16.mxu0 %v172_v7  ;;  %s180_s0 = scalar_lea.vmem %s138_s26, 256  ;;  %p185_p1 = scmp.lt.s32.totalorder %s138_s26, %s138_s26 }
   0x7   :  { %p181_p0 = scmp.ne.s32.totalorder %s138_s26, %s180_s0  ;;  %p186_p2 = scmp.lt.s32.totalorder %s180_s0, %s180_s0 }
   0x8   :  { %v23_v9 = vld [vmem:[#allocation2 + $0x8] sm:$0xff] }
   0x9   :  { %175 = vmatpush3.bf16.msra.mxu0 %v172_v7  ;;  %v22_v10 = vld [vmem:[#allocation2] sm:$0xff]  ;;  %p187_p3 = por %p186_p2, %p185_p1 }
   0xb   :  { %p188_p4 = pnand %p187_p3, %p181_p0 }
   0xc   :  { %166 = vmatmul.mubr.msk.f32.vlgmr.msra.gmra.mrb[0].mxu0 %vm19_vm0, %v25_v8 }
  0xdf   :  { %v167_v11 = vpop.f32.mrb[0].mxu0 }
  0xe0   :  { %v113_v12 = vadd.f32 %v167_v11, %v23_v9  ;;  %v103_v13 = vpop.f32.mrb[1].mxu0 }
  0xe1   :  { %v112_v14 = vadd.f32 %v103_v13, %v22_v10 }
  0xe2   :  { %115 = vst.msk [vmem:[#allocation2 + $0x8] sm:$0xff] %vm19_vm0, %v113_v12 }
  0xe3   :  { %114 = vst.msk [vmem:[#allocation2] sm:$0xff] %vm19_vm0, %v112_v14 }
  0xe9   :  { %v120_v16 = vld [vmem:[#allocation2 + $0x8] sm:$0xff] }
  0xea   :  { %v119_v17 = vld [vmem:[#allocation2] sm:$0xff]  ;;  %v129_v18 = vadd.f32 %v150_v15, %v120_v16 }
  0xeb   :  { %v128_v19 = vadd.f32 %v150_v15, %v119_v17 }
  0xec   :  { %131 = vst.msk [vmem:[#allocation3 + $0x8] sm:$0xff] %vm19_vm0, %v129_v18 }
  0xed   :  { %130 = vst.msk [vmem:[#allocation3] sm:$0xff] %vm19_vm0, %v128_v19 }
  0xee   :  { %191 = shalt.err (!%p188_p4)
}
  0xef   :  { %s192_s28 = scalar_lea.hbm %s272_s3, 256 }
  0xf0   :  { %p193_p5 = scmp.ne.s32.totalorder %s272_s3, %s192_s28  ;;  %p196_p6 = scmp.lt.u32.totalorder %s192_s28, %s272_s3 }
  0xf2   :  { %p198_p7 = pnand %p196_p6, %p193_p5 }
  0xf4   :  { %201 = shalt.err (!%p198_p7)
}
  0xf5   :  { %s206_s6 = smov 128   ;;  %s207_s7 = smov 8  }
  0xf6   :  { %143 = dma.vmem_to_hbm [thread:$0]  %s138_s26, 256, %s272_s3, [#allocation4], %s206_s6, %s206_s6, %s207_s7  }
  0xf7   :  { %202 = dma.done.wait [#allocation4], 256  }
  0xf8   :  { %203 = vsyncadd [#allocation4], 4294967040 }
  0xf9   :  { %147 = vsyncpa [#allocation4], 1 }

// kernel: parallel_mha_forward.4
= control target key start
LH: loop header
LB: loop body
LE: loop exit
PB: predicated region body
PF: predicated region fallthrough
CT: control target
= control target key end

     0   :  { %s1501_s12 = smov 0   ;;  %s1503_s13 = smov 0   ;;  %s1653_s0 = inlined_call_operand.vmem [shape: f32[3,2,8,32], index: 0, kind: input, shape index: {}, may-alias: {0,1,2}]   ;;  %s1654_s1 = inlined_call_operand.vmem [shape: f32[3,2,8,32], index: 1, kind: input, shape index: {}, may-alias: {0,1,2}]   ;;  %s1655_s2 = inlined_call_operand.vmem [shape: f32[3,2,8,32], index: 2, kind: input, shape index: {}, may-alias: {0,1,2}]   ;;  %s1656_s3 = inlined_call_operand.vmem [shape: f32[2,8,32], index: 3, kind: output, shape index: {}]  }
   0x1   :  { %s1505_s14 = smov 0  }
   0x2 LB: > { %s39_s15 = sadd.s32 1, %s1465_s13  ;;  %p1304_p0 = scmp.ge.s32.totalorder %s1469_s14, 1  ;;  %s1469_s14 = sphi %s1505_s14, %s13_s14   ;;  %s1465_s13 = sphi %s1503_s13, %s1658_s13   ;;  %s1461_s12 = sphi %s1501_s12, %s1657_s12  }
   0x3   : > { %p41_p1 = scmp.ge.s32.totalorder %s39_s15, 2  ;;  %p216_p2 = scmp.lt.s32.totalorder %s1469_s14, 3 }
   0x5   : > { %s1660_s15 = smov (%p41_p1, %s39_s15), 0  ;;  %p217_p3 = pnand %p1304_p0, %p216_p2 }
   0x6   : > { %p272_p4 = scmp.lt.s32.totalorder (!%p217_p3), %s1461_s12, 1  ;;  %vm327_vm0 = vcmask (!%p217_p3), 64512   ;;  %v1471_v0 = vmov (!%p217_p3), 0.0   ;;  %vm1472_vm1 = vmmov (!%p217_p3), 0   ;;  %vm318_vm2 = vcmask (!%p217_p3), 7168   ;;  %s1475_s23 = smov (!%p217_p3), 120  }
   0x7   : > { %220 = sbr.rel (%p217_p3) target bundleno = 1443 (0x5a3), region = 32  ;;  %1347 = vmatprep.subr.mxu0 (!%p217_p3), %v1471_v0  ;;  %328 = vst.msk [vmem:[#allocation4] sm:$0xff] (!%p217_p3), %vm327_vm0, %v1471_v0  ;;  %329 = vst.msk [vmem:[#allocation4 + $0x8] sm:$0xff] (!%p217_p3), %vm327_vm0, %v1471_v0  ;;  %1349 = vmatprep.mubr.msk.f32.mxu0 (!%p217_p3), %vm1472_vm1, %v1471_v0  ;;  %v1473_v3 = vmov (!%p217_p3), -inf   ;;  %v1474_v7 = vmov (!%p217_p3), 0   ;;  %s1476_s24 = smov (!%p217_p3), 112  }
   0x8   : > { %330 = vst.msk [vmem:[#allocation4 + $0x10] sm:$0xff] (!%p217_p3), %vm327_vm0, %v1471_v0  ;;  %331 = vst.msk [vmem:[#allocation4 + $0x18] sm:$0xff] (!%p217_p3), %vm327_vm0, %v1471_v0  ;;  %1352 = vmatprep.subr.mxu1 (!%p217_p3), %v1471_v0  ;;  %1354 = vmatprep.mubr.msk.f32.mxu1 (!%p217_p3), %vm1472_vm1, %v1471_v0  ;;  %s1477_s25 = smov (!%p217_p3), 104   ;;  %s1478_s5 = smov (!%p217_p3), 8   ;;  %vm1133_vm3 = vcmask (!%p217_p3), 130112   ;;  %vm1148_vm4 = vcmask (!%p217_p3), 195712  }
   0x9   : > { %319 = vst.msk [vmem:[#allocation2] sm:$0xff] (!%p217_p3), %vm318_vm2, %v1473_v3  ;;  %320 = vst.msk [vmem:[#allocation2 + $0x8] sm:$0xff] (!%p217_p3), %vm318_vm2, %v1473_v3  ;;  %1421 = vset.pattern.permute.xlu0 (!%p217_p3), %v1474_v7  ;;  %1422 = vset.pattern.permute.xlu1 (!%p217_p3), %v1474_v7  ;;  %s1479_s6 = smov (!%p217_p3), 16   ;;  %s1480_s7 = smov (!%p217_p3), 24   ;;  %vm1163_vm5 = vcmask (!%p217_p3), 261312  }
   0xa   : > { %321 = vst.msk [vmem:[#allocation2 + $0x10] sm:$0xff] (!%p217_p3), %vm318_vm2, %v1473_v3  ;;  %322 = vst.msk [vmem:[#allocation2 + $0x18] sm:$0xff] (!%p217_p3), %vm318_vm2, %v1473_v3 }
   0xb   : > { %323 = vst.msk [vmem:[#allocation3] sm:$0xff] (!%p217_p3), %vm318_vm2, %v1471_v0  ;;  %324 = vst.msk [vmem:[#allocation3 + $0x8] sm:$0xff] (!%p217_p3), %vm318_vm2, %v1471_v0 }
   0xc   : > { %325 = vst.msk [vmem:[#allocation3 + $0x10] sm:$0xff] (!%p217_p3), %vm318_vm2, %v1471_v0  ;;  %326 = vst.msk [vmem:[#allocation3 + $0x18] sm:$0xff] (!%p217_p3), %vm318_vm2, %v1471_v0 }
   0xe   : > { %s1662_s12 = smov (!%p272_p4, %s1461_s12), 1 }
   0xf   : > { %s1533_s16 = sshll.u32 %s1662_s12, 3 }
  0x10   : > { %s1235_s19 = scalar_lea.vmem %s1654_s1, %s1533_s16  ;;  %s281_s22 = scalar_lea.vmem %s1653_s0, %s1533_s16  ;;  %v1567_v8 = vld [vmem:[#allocation2] sm:$0xff]  ;;  %v603_v34 = vld [vmem:[#allocation2 + $0x8] sm:$0xff] }
  0x11   : > { %v1309_v1 = vld [vmem:[%s1235_s19 + $0x10] sm:$0xff]  ;;  %v332_v2 = vld [vmem:[%s281_s22] sm:$0xff]  ;;  %s1240_s28 = scalar_lea.vmem %s1655_s2, %s1533_s16  ;;  %v995_v41 = vld [vmem:[#allocation2 + $0x18] sm:$0xff]  ;;  %s1634_s4 = scalar_lea.vmem %s1656_s3, %s1533_s16 }
  0x12   : > { %1348 = vmatpush3.xpose.msk.msra.mxu0 %vm327_vm0, %v1309_v1  ;;  %526 = vrot.lane.b32.xlu1 %v1309_v1, %s1475_s23  ;;  %v1310_v12 = vld [vmem:[%s1240_s28 + $0x20] sm:$0xff]  ;;  %v799_v37 = vld [vmem:[#allocation2 + $0x10] sm:$0xff] }
  0x13   : > { %1362 = vmatprep.subr.mxu0 %v1471_v0  ;;  %1353 = vmatpush3.msra.mxu1 %v1310_v12 }
  0x14   : > { %1357 = vmatprep.subr.mxu1 %v1471_v0 }
  0x15   : > { %1350 = vmatmul.mubr.msk.f32.vlgmr.msra.gmra.mrb[0].mxu0 %vm327_vm0, %v332_v2 }
  0x16   : > { %1364 = vmatprep.mubr.msk.f32.mxu0 %vm1472_vm1, %v1471_v0  ;;  %523 = vrot.lane.b32.xlu1 %v332_v2, %s1475_s23 }
  0x1a   : > { %722 = vrot.lane.b32.xlu1 %v1309_v1, %s1476_s24 }
  0x1e   : > { %719 = vrot.lane.b32.xlu1 %v332_v2, %s1476_s24 }
  0x22   : > { %918 = vrot.lane.b32.xlu1 %v1309_v1, %s1477_s25 }
  0x26   : > { %915 = vrot.lane.b32.xlu1 %v332_v2, %s1477_s25 }
  0x84   : > { %v527_v13 = vpop.permute.xlu1 %526 }
  0x88   : > { %v524_v16 = vpop.permute.xlu1 %523 }
  0x8c   : > { %v723_v18 = vpop.permute.xlu1 %722 }
  0x90   : > { %v720_v19 = vpop.permute.xlu1 %719 }
  0x94   : > { %v919_v21 = vpop.permute.xlu1 %918 }
  0x98   : > { %v916_v22 = vpop.permute.xlu1 %915 }
  0xe8   : > { %v408_v4 = vpop.f32.mrb[0].mxu0 }
  0xe9   : > { %v1351_v5 = vpop.f32.mrb[1].mxu0  ;;  %v413_v6 = vsel %vm327_vm0, %v408_v4, -inf }
  0xea   : > { %414 = vmax.xlane.f32.xlu0 %v413_v6 }
 0x177   : > { %v415_v9 = vpop.xlane.xlu0 %414 }
 0x178   : > { %v1570_v10 = vmax.f32 %v1567_v8, %v415_v9 }
 0x17a   : > { %v417_v11 = vsub.f32 %v1567_v8, %v1570_v10  ;;  %518 = vst.msk [vmem:[#allocation2] sm:$0xff] %vm318_vm2, %v1570_v10  ;;  %422 = vperm.xlu0 %1421, %v1570_v10   ;;  %v620_v10 = vld [vmem:[#allocation3 + $0x8] sm:$0xff] }
 0x1f9   : > { %v423_v14 = vpop.permute.xlu0 %422 }
 0x1fa   : > { %v425_v15 = vsub.f32 %v408_v4, %v423_v14  ;;  %v418_v4 = vmul.f32 1.442695, %v417_v11 }
 0x1fc   : > { %v426_v17 = vmul.f32 1.442695, %v425_v15 }
 0x1fe   : > { %1423 = vpow2.f32 %v426_v17 }
 0x208   : > { %v1424_v20 = vpop.eup %1423 }
 0x209   : > { %1355 = vmatmul.mubr.msk.f32.vlgmr.msra.gmra.mrb[0].mxu1 %vm327_vm0, %v1424_v20  ;;  %v430_v46 = vsel %vm327_vm0, %v1424_v20, 0.0 }
 0x20a   : > { %1358 = vmatpush3.xpose.msk.msra.mxu1 %vm327_vm0, %v527_v13  ;;  %1359 = vmatprep.mubr.msk.f32.mxu1 %vm1472_vm1, %v1471_v0 }
 0x20b   : > { %1367 = vmatprep.subr.mxu1 %v1471_v0 }
 0x20d   : > { %1360 = vmatmul.mubr.msk.f32.vlgmr.msra.gmra.mrb[2].mxu1 %vm327_vm0, %v524_v16 }
 0x20e   : > { %1368 = vmatpush3.xpose.msk.msra.mxu1 %vm327_vm0, %v723_v18  ;;  %1369 = vmatprep.mubr.msk.f32.mxu1 %vm1472_vm1, %v1471_v0  ;;  %v816_v18 = vld [vmem:[#allocation3 + $0x10] sm:$0xff] }
 0x20f   : > { %1377 = vmatprep.subr.mxu1 %v1471_v0 }
 0x211   : > { %1370 = vmatmul.mubr.msk.f32.vlgmr.msra.gmra.mrb[4].mxu1 %vm327_vm0, %v720_v19 }
 0x212   : > { %1378 = vmatpush3.xpose.msk.msra.mxu1 %vm327_vm0, %v919_v21  ;;  %1379 = vmatprep.mubr.msk.f32.mxu1 %vm1472_vm1, %v1471_v0 }
 0x215   : > { %1380 = vmatmul.mubr.msk.f32.vlgmr.msra.gmra.mrb[6].mxu1 %vm327_vm0, %v916_v22  ;;  %v1012_v22 = vld [vmem:[#allocation3 + $0x18] sm:$0xff] }
 0x2dc   : > { %v1597_v23 = vpop.f32.mrb[0].mxu1 }
 0x2dd   : > { %v1356_v24 = vpop.f32.mrb[1].mxu1 }
 0x2e0   : > { %v598_v25 = vpop.f32.mrb[2].mxu1 }
 0x2e1   : > { %v1361_v26 = vpop.f32.mrb[3].mxu1  ;;  %v604_v27 = vsel %vm327_vm0, %v598_v25, -inf }
 0x2e2   : > { %605 = vmax.xlane.f32.xlu1 %v604_v27 }
 0x2e4   : > { %v794_v28 = vpop.f32.mrb[4].mxu1 }
 0x2e5   : > { %v1371_v29 = vpop.f32.mrb[5].mxu1  ;;  %v800_v30 = vsel %vm327_vm0, %v794_v28, -inf }
 0x2e6   : > { %801 = vmax.xlane.f32.xlu0 %v800_v30  ;;  %v436_v29 = vld [vmem:[#allocation4] sm:$0xff] }
 0x2e8   : > { %v990_v31 = vpop.f32.mrb[6].mxu1 }
 0x2e9   : > { %v1381_v32 = vpop.f32.mrb[7].mxu1  ;;  %v996_v33 = vsel %vm327_vm0, %v990_v31, -inf }
 0x2ea   : > { %997 = vmax.xlane.f32.xlu1 %v996_v33 }
 0x36f   : > { %v606_v35 = vpop.xlane.xlu1 %605 }
 0x370   : > { %v607_v36 = vmax.f32 %v603_v34, %v606_v35 }
 0x372   : > { %v608_v38 = vsub.f32 %v603_v34, %v607_v36  ;;  %714 = vst.msk [vmem:[#allocation2 + $0x8] sm:$0xff] %vm318_vm2, %v607_v36  ;;  %613 = vperm.xlu1 %1422, %v607_v36  }
 0x373   : > { %v802_v39 = vpop.xlane.xlu0 %801 }
 0x374   : > { %v803_v40 = vmax.f32 %v799_v37, %v802_v39  ;;  %v609_v1 = vmul.f32 1.442695, %v608_v38 }
 0x376   : > { %v804_v42 = vsub.f32 %v799_v37, %v803_v40  ;;  %910 = vst.msk [vmem:[#allocation2 + $0x10] sm:$0xff] %vm318_vm2, %v803_v40  ;;  %809 = vperm.xlu0 %1421, %v803_v40  }
 0x377   : > { %v998_v43 = vpop.xlane.xlu1 %997 }
 0x378   : > { %v999_v44 = vmax.f32 %v995_v41, %v998_v43  ;;  %v805_v5 = vmul.f32 1.442695, %v804_v42  ;;  %v628_v42 = vld [vmem:[#allocation4 + $0x8] sm:$0xff] }
 0x37a   : > { %v1000_v45 = vsub.f32 %v995_v41, %v999_v44  ;;  %1106 = vst.msk [vmem:[#allocation2 + $0x18] sm:$0xff] %vm318_vm2, %v999_v44  ;;  %1005 = vperm.xlu1 %1422, %v999_v44   ;;  %v824_v44 = vld [vmem:[#allocation4 + $0x10] sm:$0xff] }
 0x37c   : > { %v1001_v3 = vmul.f32 1.442695, %v1000_v45 }
 0x37e   : > { %636 = vrot.lane.b32.xlu1 %v1310_v12, %s1475_s23 }
 0x382   : > { %832 = vrot.lane.b32.xlu1 %v1310_v12, %s1476_s24 }
 0x386   : > { %1028 = vrot.lane.b32.xlu1 %v1310_v12, %s1477_s25  ;;  %v428_v12 = vld [vmem:[#allocation3] sm:$0xff] }
 0x3aa   : > { %431 = vadd.xlane.f32.xlu1 %v430_v46 }
 0x3f1   : > { %v614_v47 = vpop.permute.xlu1 %613 }
 0x3f2   : > { %v616_v48 = vsub.f32 %v598_v25, %v614_v47 }
 0x3f4   : > { %v617_v49 = vmul.f32 1.442695, %v616_v48 }
 0x3f5   : > { %v810_v50 = vpop.permute.xlu0 %809 }
 0x3f6   : > { %1425 = vpow2.f32 %v617_v49  ;;  %v812_v51 = vsub.f32 %v794_v28, %v810_v50  ;;  %v1020_v50 = vld [vmem:[#allocation4 + $0x18] sm:$0xff] }
 0x3f8   : > { %v813_v52 = vmul.f32 1.442695, %v812_v51 }
 0x3f9   : > { %v1006_v53 = vpop.permute.xlu1 %1005 }
 0x3fa   : > { %1427 = vpow2.f32 %v813_v52  ;;  %v1008_v54 = vsub.f32 %v990_v31, %v1006_v53 }
 0x3fc   : > { %v1009_v55 = vmul.f32 1.442695, %v1008_v54 }
 0x3fd   : > { %v637_v56 = vpop.permute.xlu1 %636 }
 0x3fe   : > { %1429 = vpow2.f32 %v1009_v55  ;;  %1363 = vmatpush3.msra.mxu0 %v637_v56 }
 0x3ff   : > { %1372 = vmatprep.subr.mxu0 %v1471_v0  ;;  %1431 = vpow2.f32 %v609_v1 }
 0x400   : > { %v1426_v57 = vpop.eup %1425  ;;  %1433 = vpow2.f32 %v1001_v3 }
 0x401   : > { %1365 = vmatmul.mubr.msk.f32.vlgmr.msra.gmra.mrb[2].mxu0 %vm327_vm0, %v1426_v57  ;;  %v622_v58 = vsel %vm327_vm0, %v1426_v57, 0.0  ;;  %v833_v59 = vpop.permute.xlu1 %832  ;;  %1435 = vpow2.f32 %v418_v4 }
 0x402   : > { %623 = vadd.xlane.f32.xlu0 %v622_v58  ;;  %1373 = vmatpush3.msra.mxu0 %v833_v59  ;;  %1437 = vpow2.f32 %v805_v5 }
 0x403   : > { %1374 = vmatprep.mubr.msk.f32.mxu0 %vm1472_vm1, %v1471_v0  ;;  %1382 = vmatprep.subr.mxu0 %v1471_v0 }
 0x404   : > { %v1428_v60 = vpop.eup %1427 }
 0x405   : > { %1375 = vmatmul.mubr.msk.f32.vlgmr.msra.gmra.mrb[4].mxu0 %vm327_vm0, %v1428_v60  ;;  %v818_v61 = vsel %vm327_vm0, %v1428_v60, 0.0  ;;  %v1029_v62 = vpop.permute.xlu1 %1028 }
 0x406   : > { %819 = vadd.xlane.f32.xlu1 %v818_v61  ;;  %1383 = vmatpush3.msra.mxu0 %v1029_v62 }
 0x407   : > { %1384 = vmatprep.mubr.msk.f32.mxu0 %vm1472_vm1, %v1471_v0 }
 0x408   : > { %v1430_v63 = vpop.eup %1429 }
 0x409   : > { %1385 = vmatmul.mubr.msk.f32.vlgmr.msra.gmra.mrb[6].mxu0 %vm327_vm0, %v1430_v63  ;;  %v1014_v2 = vsel %vm327_vm0, %v1430_v63, 0.0  ;;  %v1432_v6 = vpop.eup %1431 }
 0x40a   : > { %1015 = vadd.xlane.f32.xlu0 %v1014_v2  ;;  %v1434_v0 = vpop.eup %1433  ;;  %v621_v11 = vmul.f32 %v1432_v6, %v620_v10 }
 0x40b   : > { %v1436_v7 = vpop.eup %1435  ;;  %v1013_v25 = vmul.f32 %v1434_v0, %v1012_v22 }
 0x40c   : > { %v1438_v9 = vpop.eup %1437  ;;  %v429_v13 = vmul.f32 %v1436_v7, %v428_v12 }
 0x40d   : > { %v817_v20 = vmul.f32 %v1438_v9, %v816_v18 }
 0x417   : > { %631 = vperm.xlu1 %1422, %v1432_v6  }
 0x41b   : > { %1023 = vperm.xlu1 %1422, %v1434_v0  }
 0x420   : > { %439 = vperm.xlu0 %1421, %v1436_v7  }
 0x424   : > { %827 = vperm.xlu0 %1421, %v1438_v9  }
 0x437   : > { %v432_v14 = vpop.xlane.xlu1 %431 }
 0x438   : > { %v433_v15 = vadd.f32 %v432_v14, %v429_v13 }
 0x43a   : > { %435 = vst.msk [vmem:[#allocation3] sm:$0xff] %vm318_vm2, %v433_v15 }
 0x441   : > { %v1110_v16 = vld [vmem:[#allocation3] sm:$0xff] }
 0x442   : > { %1439 = vrcp.f32 %v1110_v16 }
 0x44c   : > { %v1440_v8 = vpop.eup %1439 }
 0x44d   : > { %1115 = vperm.xlu1 %1422, %v1440_v8  }
 0x48f   : > { %v624_v17 = vpop.xlane.xlu0 %623 }
 0x490   : > { %v625_v19 = vadd.f32 %v624_v17, %v621_v11 }
 0x492   : > { %626 = vst.msk [vmem:[#allocation3 + $0x8] sm:$0xff] %vm318_vm2, %v625_v19 }
 0x493   : > { %v820_v21 = vpop.xlane.xlu1 %819 }
 0x494   : > { %v821_v24 = vadd.f32 %v820_v21, %v817_v20 }
 0x496   : > { %822 = vst.msk [vmem:[#allocation3 + $0x10] sm:$0xff] %vm318_vm2, %v821_v24 }
 0x497   : > { %v1016_v26 = vpop.xlane.xlu0 %1015  ;;  %v632_v38 = vpop.permute.xlu1 %631 }
 0x498   : > { %v1017_v27 = vadd.f32 %v1016_v26, %v1013_v25  ;;  %v634_v43 = vmul.f32 %v632_v38, %v628_v42 }
 0x499   : > { %v1120_v28 = vld [vmem:[#allocation3 + $0x8] sm:$0xff] }
 0x49a   : > { %1018 = vst.msk [vmem:[#allocation3 + $0x18] sm:$0xff] %vm318_vm2, %v1017_v27  ;;  %1441 = vrcp.f32 %v1120_v28 }
 0x49b   : > { %v1024_v39 = vpop.permute.xlu1 %1023 }
 0x49c   : > { %v1026_v54 = vmul.f32 %v1024_v39, %v1020_v50 }
 0x49d   : > { %v1135_v30 = vld [vmem:[#allocation3 + $0x10] sm:$0xff] }
 0x49e   : > { %1443 = vrcp.f32 %v1135_v30 }
 0x49f   : > { %v440_v31 = vpop.permute.xlu0 %439 }
 0x4a0   : > { %v442_v32 = vmul.f32 %v440_v31, %v436_v29 }
 0x4a1   : > { %v1150_v33 = vld [vmem:[#allocation3 + $0x18] sm:$0xff] }
 0x4a2   : > { %v516_v34 = vadd.f32 %v1597_v23, %v442_v32  ;;  %1445 = vrcp.f32 %v1150_v33 }
 0x4a3   : > { %v828_v45 = vpop.permute.xlu0 %827 }
 0x4a4   : > { %v1442_v35 = vpop.eup %1441  ;;  %517 = vst.msk [vmem:[#allocation4] sm:$0xff] %vm327_vm0, %v516_v34  ;;  %v830_v49 = vmul.f32 %v828_v45, %v824_v44 }
 0x4a5   : > { %1125 = vperm.xlu0 %1421, %v1442_v35  }
 0x4a8   : > { %v1444_v36 = vpop.eup %1443 }
 0x4a9   : > { %1140 = vperm.xlu0 %1421, %v1444_v36  }
 0x4ab   : > { %v1112_v40 = vld [vmem:[#allocation4] sm:$0xff] }
 0x4ac   : > { %v1446_v37 = vpop.eup %1445 }
 0x4ad   : > { %1155 = vperm.xlu0 %1421, %v1446_v37  }
 0x4cc   : > { %v1116_v41 = vpop.permute.xlu1 %1115 }
 0x4cd   : > { %v1118_v23 = vmul.f32 %v1116_v41, %v1112_v40 }
 0x4cf   : > { %1119 = vst.msk [vmem:[%s1634_s4] sm:$0xff] %vm327_vm0, %v1118_v23 }
 0x4d4   : > { %v708_v46 = vpop.f32.mrb[2].mxu0 }
 0x4d5   : > { %v712_v47 = vadd.f32 %v708_v46, %v634_v43  ;;  %v1366_v48 = vpop.f32.mrb[3].mxu0 }
 0x4d7   : > { %713 = vst.msk [vmem:[#allocation4 + $0x8] sm:$0xff] %vm327_vm0, %v712_v47 }
 0x4d8   : > { %v904_v51 = vpop.f32.mrb[4].mxu0 }
 0x4d9   : > { %v908_v52 = vadd.f32 %v904_v51, %v830_v49  ;;  %v1376_v53 = vpop.f32.mrb[5].mxu0 }
 0x4db   : > { %909 = vst.msk [vmem:[#allocation4 + $0x10] sm:$0xff] %vm327_vm0, %v908_v52 }
 0x4dc   : > { %v1100_v55 = vpop.f32.mrb[6].mxu0 }
 0x4dd   : > { %v1104_v56 = vadd.f32 %v1100_v55, %v1026_v54  ;;  %v1386_v57 = vpop.f32.mrb[7].mxu0 }
 0x4de   : > { %v1122_v59 = vld [vmem:[#allocation4 + $0x8] sm:$0xff] }
 0x4df   : > { %1105 = vst.msk [vmem:[#allocation4 + $0x18] sm:$0xff] %vm327_vm0, %v1104_v56 }
 0x4e2   : > { %v1137_v62 = vld [vmem:[#allocation4 + $0x10] sm:$0xff] }
 0x4e6   : > { %v1152_v2 = vld [vmem:[#allocation4 + $0x18] sm:$0xff] }
 0x524   : > { %v1126_v58 = vpop.permute.xlu0 %1125 }
 0x525   : > { %v1128_v60 = vmul.f32 %v1126_v58, %v1122_v59 }
 0x527   : > { %1130 = vrot.lane.b32.xlu1 %v1128_v60, %s1478_s5 }
 0x528   : > { %v1141_v61 = vpop.permute.xlu0 %1140 }
 0x529   : > { %v1143_v63 = vmul.f32 %v1141_v61, %v1137_v62 }
 0x52b   : > { %1145 = vrot.lane.b32.xlu1 %v1143_v63, %s1479_s6 }
 0x52c   : > { %v1156_v1 = vpop.permute.xlu0 %1155 }
 0x52d   : > { %v1158_v3 = vmul.f32 %v1156_v1, %v1152_v2 }
 0x52f   : > { %1160 = vrot.lane.b32.xlu1 %v1158_v3, %s1480_s7 }
 0x599   : > { %v1131_v4 = vpop.permute.xlu1 %1130 }
 0x59a   : > { %1134 = vst.msk [vmem:[%s1634_s4] sm:$0xff] %vm1133_vm3, %v1131_v4 }
 0x59d   : > { %v1146_v5 = vpop.permute.xlu1 %1145 }
 0x59e   : > { %1149 = vst.msk [vmem:[%s1634_s4] sm:$0xff] %vm1148_vm4, %v1146_v5 }
 0x5a1   : > { %v1161_v6 = vpop.permute.xlu1 %1160 }
 0x5a2   : > { %1164 = vst.msk [vmem:[%s1634_s4] sm:$0xff] %vm1163_vm5, %v1161_v6 }
 0x5a3 PF: > { %s13_s14 = sadd.s32 1, %s1469_s14   ;;  %s1657_s12 = smov %s1465_s13 }
 0x5a4   : > { %p10_p5 = scmp.ge.s32.totalorder %s13_s14, 4   ;;  %s1658_s13 = smov %s1660_s15 }
 0x5a6   :  { %12 = sbr.rel (!%p10_p5) target bundleno = 2 (0x2), region = 85 }

</bundles_post_ra>
